<compile_context>
chip_gen: v5e
topology: v5e:2x2
jax: 0.10.0
libtpu: 0.0.40
codegen_flags: <defaults>
</compile_context>

<pallas_src>
import functools

import jax
import jax.numpy as jnp
from jax.experimental import pallas as pl
from jax.experimental.pallas import tpu as pltpu


def _gelu(x):
    # TODO(synk): PyTorch nn.GELU() default is the exact erf form; tanh approximation
    # is used because erf has no guaranteed Mosaic lowering.
    c = 0.7978845608028654  # sqrt(2/pi)
    return 0.5 * x * (1.0 + jnp.tanh(c * (x + 0.044715 * x * x * x)))


def _adjust_net(att, infer, adj):
    """adjustment_net(cat(att, infer)): Linear(2,4)+GELU, Linear(4,4)+GELU,
    Linear(4,1)+Sigmoid.  `adj` is a (16,4) parameter tile:
      rows 0-1: wa1 (2,4), row 2: ba1, rows 3-6: wa2 (4,4), row 7: ba2,
      row 8: wa3 (as a (1,4) row), row 9 col 0: ba3, row 10: [b2_vis, b2_lang].
    All pure VPU/EUP broadcast work."""
    h1 = _gelu(adj[2:3, :] + att * adj[0:1, :] + infer * adj[1:2, :])      # (bb,N,4)
    h2 = adj[7:8, :] + h1[..., 0:1] * adj[3:4, :]
    for k in range(1, 4):
        h2 = h2 + h1[..., k:k + 1] * adj[3 + k:4 + k, :]
    h2 = _gelu(h2)                                                          # (bb,N,4)
    z = adj[9:10, 0:1] + h2[..., 0:1] * adj[8:9, 0:1]
    for k in range(1, 4):
        z = z + h2[..., k:k + 1] * adj[8:9, k:k + 1]
    return jax.nn.sigmoid(z)                                                # (bb,N,1)


def _qa_head_kernel(obj_x_ref, obj_side_ref, txt_x_ref, txt_valid_ref,
                    vec_ref, w1_ref, wm_ref, wc1_ref, wc2_ref, out_ref,
                    *, M, F, Hh, A):
    # Tiny adjustment-net params + scalar attention biases live at rows 16.. of `vec`.
    adj = vec_ref[16:32, 0:4]                                              # (16,4) f32

    def att_flat(x_ref, valid, w1, b1, w2t, b2, infer=None):
        bb, N, H = x_ref.shape
        x = x_ref[...]                                                     # (bb,N,H) bf16
        # MLP(H->M)+GELU (+Dropout: identity) as one batched MXU dot, bf16 in / f32 acc.
        mid = _gelu(jnp.dot(x.reshape(bb * N, H), w1,
                            preferred_element_type=jnp.float32) + b1)      # (bb*N,M) f32
        # Linear(M->1) (glimpse=1) as a lane reduction against w2^T.
        att = (jnp.sum(mid * w2t, axis=-1, keepdims=True) + b2).reshape(bb, N, 1)
        # masked_fill(logical_not(valid), -1e9) BEFORE the adjustment net (as in PyTorch).
        att = jnp.where(valid > 0.5, att, jnp.float32(-1e9))
        if infer is not None:
            att = att * _adjust_net(att, infer, adj)
        # softmax over the sequence axis (PyTorch dim=1); EUP reciprocal for the denom.
        att = att - jnp.max(att, axis=1, keepdims=True)
        p = jnp.exp(att)
        p = p * pl.reciprocal(jnp.sum(p, axis=1, keepdims=True), approx=True)
        # Attention pooling: VPU multiply + sublane reduce (fine for N<=16).
        return jnp.sum(p * x.astype(jnp.float32), axis=1)                  # (bb,H) f32

    obj_side = obj_side_ref[...]                                           # (bb,N_obj,2)
    pooled_obj = att_flat(obj_x_ref, obj_side[..., 0:1], w1_ref[0],
                          vec_ref[0:1, :M], vec_ref[1:2, :M],
                          adj[10:11, 0:1], infer=obj_side[..., 1:2])
    pooled_lang = att_flat(txt_x_ref, txt_valid_ref[...], w1_ref[1],
                           vec_ref[2:3, :M], vec_ref[3:4, :M],
                           adj[10:11, 1:2])

    # Fused linear_merge + fusion add: [pooled_obj | pooled_lang] @ [[wm_v];[wm_l]]
    # is lang_feat + obj_feat directly (bias sum pre-packed in vec row 4).
    pooled = jnp.concatenate([pooled_obj, pooled_lang], axis=-1).astype(jnp.bfloat16)
    f = jnp.dot(pooled, wm_ref[...],
                preferred_element_type=jnp.float32) + vec_ref[4:5, :F]     # (bb,F) f32

    # fusion_norm(LayerNorm) -> answer_cls: Linear+GELU(+Dropout: identity)+Linear.
    mu = jnp.mean(f, axis=-1, keepdims=True)
    var = jnp.mean(jnp.square(f - mu), axis=-1, keepdims=True)
    fn = (f - mu) * jax.lax.rsqrt(var + 1e-5) * vec_ref[5:6, :F] + vec_ref[6:7, :F]
    h = _gelu(jnp.dot(fn.astype(jnp.bfloat16), wc1_ref[...],
                      preferred_element_type=jnp.float32) + vec_ref[7:8, :Hh])
    out_ref[...] = (jnp.dot(h.astype(jnp.bfloat16), wc2_ref[...],
                            preferred_element_type=jnp.float32)
                    + vec_ref[8:9, :A]).astype(out_ref.dtype)


# ------------------------- parameter packing (done ONCE) -----------------------
def pack_params(params):
    """Pack raw parameters into the kernel's consolidated DMA streams.
    Called once at parameter-load time — keeps scatter/cast ops out of the hot path."""
    p_vis, p_lang, p_head = (params["attflat_visual"], params["attflat_lang"],
                             params["head"])
    H, M = p_vis["w1"].shape
    F_ = p_vis["wm"].shape[1]
    Hh = p_head["wc1"].shape[1]
    A = p_head["wc2"].shape[1]
    Lp = ((max(M, F_, Hh, A) + 127) // 128) * 128

    vec = jnp.zeros((32, Lp), jnp.float32)
    vec = vec.at[0, :M].set(p_vis["b1"][0])
    vec = vec.at[1, :M].set(p_vis["w2t"][0])
    vec = vec.at[2, :M].set(p_lang["b1"][0])
    vec = vec.at[3, :M].set(p_lang["w2t"][0])
    vec = vec.at[4, :F_].set(p_vis["bm"][0] + p_lang["bm"][0])   # fused-merge bias sum
    vec = vec.at[5, :F_].set(p_head["ln_w"][0])
    vec = vec.at[6, :F_].set(p_head["ln_b"][0])
    vec = vec.at[7, :Hh].set(p_head["bc1"][0])
    vec = vec.at[8, :A].set(p_head["bc2"][0])
    # Adjustment net + scalar attention biases at rows 16.. (cols 0:4).
    vec = vec.at[16:18, 0:4].set(p_vis["wa1"])
    vec = vec.at[18, 0:4].set(p_vis["ba1"][0])
    vec = vec.at[19:23, 0:4].set(p_vis["wa2"])
    vec = vec.at[23, 0:4].set(p_vis["ba2"][0])
    vec = vec.at[24, 0:4].set(p_vis["wa3"][:, 0])
    vec = vec.at[25, 0].set(p_vis["ba3"][0, 0])
    vec = vec.at[26, 0].set(p_vis["b2"][0, 0])
    vec = vec.at[26, 1].set(p_lang["b2"][0, 0])

    bf16 = jnp.bfloat16
    return {
        "vec": vec,                                                          # (32,Lp) f32
        "w1": jnp.stack([p_vis["w1"], p_lang["w1"]], 0).astype(bf16),        # (2,H,M)
        "wm": jnp.concatenate([p_vis["wm"], p_lang["wm"]], 0).astype(bf16),  # (2H,F)
        "wc1": p_head["wc1"].astype(bf16),                                   # (F,Hh)
        "wc2": p_head["wc2"].astype(bf16),                                   # (Hh,A)
    }


# ------------------------------ wrapper ---------------------------------------
def qa_head_sup_att_forward(obj_embeds, obj_masks, txt_embeds, txt_masks,
                            infer_attention_mask, packed, *, batch_block=None):
    """Fused forward pass. `packed` comes from pack_params().
    batch_block=None (default, recommended for small/medium B) processes the whole
    batch in one grid step; setting it re-introduces a "parallel" batch grid axis
    (only worthwhile for very large B — it replicates the weight DMA per step)."""
    B, N_obj, H = obj_embeds.shape
    N_txt = txt_embeds.shape[1]
    _, Hw, M = packed["w1"].shape
    F_ = packed["wm"].shape[1]
    Hh, A = packed["wc2"].shape
    Lp = packed["vec"].shape[1]
    assert Hw == H

    bb = B if batch_block is None else batch_block
    assert B % bb == 0, "batch_block must divide the batch size"

    bf16 = jnp.bfloat16
    # obj_masks / txt_masks: (B,1,1,N) bool, True = real token (the PyTorch forward
    # masks out logical_not(mask)).  Pack [valid, infer] into a single side stream.
    obj_valid = obj_masks.reshape(B, N_obj, 1).astype(jnp.float32)
    infer = infer_attention_mask.reshape(B, N_obj, 1).astype(jnp.float32)
    obj_side = jnp.concatenate([obj_valid, infer], axis=-1)                 # (B,N_obj,2)
    txt_valid = txt_masks.reshape(B, N_txt, 1).astype(jnp.float32)

    args = [
        obj_embeds.astype(bf16), obj_side,
        txt_embeds.astype(bf16), txt_valid,
        packed["vec"], packed["w1"], packed["wm"], packed["wc1"], packed["wc2"],
    ]

    def batched(shape):
        nrest = len(shape) - 1
        return pl.BlockSpec((bb,) + tuple(shape[1:]),
                            lambda i, nrest=nrest: (i,) + (0,) * nrest)

    def repl(shape):
        nd = len(shape)
        return pl.BlockSpec(tuple(shape), lambda i, nd=nd: (0,) * nd)

    in_specs = [
        batched((B, N_obj, H)), batched((B, N_obj, 2)),
        batched((B, N_txt, H)), batched((B, N_txt, 1)),
        repl((32, Lp)), repl((2, H, M)), repl((2 * H, F_)),
        repl((F_, Hh)), repl((Hh, A)),
    ]

    kernel = functools.partial(_qa_head_kernel, M=M, F=F_, Hh=Hh, A=A)
    return pl.pallas_call(
        kernel,
        grid=(B // bb,),
        in_specs=in_specs,
        out_specs=pl.BlockSpec((bb, A), lambda i: (i, 0)),
        out_shape=jax.ShapeDtypeStruct((B, A), jnp.float32),
        compiler_params=pltpu.CompilerParams(dimension_semantics=("parallel",)),
    )(*args)


# ------------------------------ parameter init ---------------------------------
def _dense(key, fan_in, fan_out, scale=0.02):
    kw, kb = jax.random.split(key)
    w = jax.random.normal(kw, (fan_in, fan_out), jnp.float32) * scale
    b = jax.random.normal(kb, (1, fan_out), jnp.float32) * scale
    return w, b


def init_attflat_params(key, hidden, mid, flat_out):
    keys = jax.random.split(key, 6)
    p = {}
    p["w1"], p["b1"] = _dense(keys[0], hidden, mid)
    w2, p["b2"] = _dense(keys[1], mid, 1)          # glimpse = 1
    p["w2t"] = w2.T                                 # (1, mid) -> lane reduction in kernel
    p["wm"], p["bm"] = _dense(keys[2], hidden, flat_out)
    p["wa1"], p["ba1"] = _dense(keys[3], 2, 4, scale=0.5)
    p["wa2"], p["ba2"] = _dense(keys[4], 4, 4, scale=0.5)
    p["wa3"], p["ba3"] = _dense(keys[5], 4, 1, scale=0.5)
    return p


def init_params(key, hidden, mid, flat_out, num_answers):
    k_vis, k_lang, k_c1, k_c2 = jax.random.split(key, 4)
    head = {
        "ln_w": jnp.ones((1, flat_out), jnp.float32),
        "ln_b": jnp.zeros((1, flat_out), jnp.float32),
    }
    head["wc1"], head["bc1"] = _dense(k_c1, flat_out, hidden)
    head["wc2"], head["bc2"] = _dense(k_c2, hidden, num_answers)
    return {
        "attflat_visual": init_attflat_params(k_vis, hidden, mid, flat_out),
        "attflat_lang": init_attflat_params(k_lang, hidden, mid, flat_out),
        "head": head,
    }


# ------------------------------ pure-JAX reference ------------------------------
def _reference_forward(obj_embeds, obj_masks, txt_embeds, txt_masks,
                       infer_attention_mask, params):
    B = obj_embeds.shape[0]

    def att_flat(x, mask, p, infer=None):
        N = x.shape[1]
        valid = mask.reshape(B, N, 1).astype(jnp.float32)
        mid = _gelu(x @ p["w1"] + p["b1"])
        att = mid @ p["w2t"].T + p["b2"]
        att = jnp.where(valid > 0.5, att, -1e9)
        if infer is not None:
            h1 = _gelu(att * p["wa1"][0] + infer * p["wa1"][1] + p["ba1"])
            h2 = _gelu(h1 @ p["wa2"] + p["ba2"])
            att = att * jax.nn.sigmoid(h2 @ p["wa3"] + p["ba3"])
        att = jax.nn.softmax(att, axis=1)
        pooled = jnp.sum(att * x, axis=1)
        return pooled @ p["wm"] + p["bm"]

    infer = infer_attention_mask.reshape(B, -1, 1).astype(jnp.float32)
    obj_feat = att_flat(obj_embeds, obj_masks, params["attflat_visual"], infer)
    lang_feat = att_flat(txt_embeds, txt_masks, params["attflat_lang"])
    f = lang_feat + obj_feat
    ph = params["head"]
    mu = jnp.mean(f, -1, keepdims=True)
    var = jnp.mean(jnp.square(f - mu), -1, keepdims=True)
    fn = (f - mu) * jax.lax.rsqrt(var + 1e-5) * ph["ln_w"] + ph["ln_b"]
    h = _gelu(fn @ ph["wc1"] + ph["bc1"])
    return h @ ph["wc2"] + ph["bc2"]


if __name__ == "__main__":
    key = jax.random.PRNGKey(0)
    B, N_OBJ, N_TXT = 2, 16, 8
    HIDDEN, MLP_SIZE, FLAT_OUT, NUM_ANSWERS = 128, 128, 128, 256

    k_obj, k_txt, k_inf, k_par = jax.random.split(key, 4)
    obj_embeds = jax.random.normal(k_obj, (B, N_OBJ, HIDDEN), jnp.float32)
    txt_embeds = jax.random.normal(k_txt, (B, N_TXT, HIDDEN), jnp.float32)
    # masks: (B, 1, 1, N) bool, True = real token
    obj_masks = (jnp.arange(N_OBJ)[None, None, None, :]
                 < jnp.array([12, 9])[:, None, None, None])
    txt_masks = (jnp.arange(N_TXT)[None, None, None, :]
                 < jnp.array([6, 8])[:, None, None, None])
    infer_attention_mask = jax.random.uniform(k_inf, (B, N_OBJ), dtype=jnp.float32)

    params = init_params(k_par, HIDDEN, MLP_SIZE, FLAT_OUT, NUM_ANSWERS)
    packed = pack_params(params)   # once, outside the hot path

    # Default / recommended path: single fused grid step, whole batch at once, one TC.
    scores = qa_head_sup_att_forward(obj_embeds, obj_masks, txt_embeds,
                                     txt_masks, infer_attention_mask, packed)
    jax.block_until_ready(scores)

    ref = _reference_forward(obj_embeds, obj_masks, txt_embeds, txt_masks,
                             infer_attention_mask, params)
    jax.block_until_ready(ref)

    assert scores.shape == (B, NUM_ANSWERS) and scores.dtype == jnp.float32
    assert bool(jnp.all(jnp.isfinite(scores)))
    # bf16 MXU operands + approx reciprocal + tanh-GELU => loose (but tiny-abs) tolerance.
    assert bool(jnp.allclose(scores, ref, rtol=2e-2, atol=2e-2))
    print("KERNEL_OK")
</pallas_src>

<mosaic_0001>
module attributes {stable_mosaic.version = 11 : i64} {
  func.func @_qa_head_kernel(%arg0: i32, %arg1: memref<2x16x128xbf16, #tpu.memory_space<vmem>>, %arg2: memref<2x16x2xf32, #tpu.memory_space<vmem>>, %arg3: memref<2x8x128xbf16, #tpu.memory_space<vmem>>, %arg4: memref<2x8x1xf32, #tpu.memory_space<vmem>>, %arg5: memref<32x256xf32, #tpu.memory_space<vmem>>, %arg6: memref<2x128x128xbf16, #tpu.memory_space<vmem>>, %arg7: memref<256x128xbf16, #tpu.memory_space<vmem>>, %arg8: memref<128x128xbf16, #tpu.memory_space<vmem>>, %arg9: memref<128x256xbf16, #tpu.memory_space<vmem>>, %arg10: memref<2x256xf32, #tpu.memory_space<vmem>>) attributes {dimension_semantics = [#tpu.dimension_semantics<parallel>], iteration_bounds = array<i64: 1>, scalar_prefetch = 0 : i64, scratch_operands = 0 : i64, tpu.core_type = #tpu.core_type<tc>, window_params = [{transform_indices = @transform_0, window_bounds = array<i64: 2, 16, 128>}, {transform_indices = @transform_1, window_bounds = array<i64: 2, 16, 2>}, {transform_indices = @transform_2, window_bounds = array<i64: 2, 8, 128>}, {transform_indices = @transform_3, window_bounds = array<i64: 2, 8, 1>}, {pipeline_mode = #tpu.pipeline_mode<synchronous>, transform_indices = @transform_4, window_bounds = array<i64: 32, 256>}, {pipeline_mode = #tpu.pipeline_mode<synchronous>, transform_indices = @transform_5, window_bounds = array<i64: 2, 128, 128>}, {pipeline_mode = #tpu.pipeline_mode<synchronous>, transform_indices = @transform_6, window_bounds = array<i64: 256, 128>}, {pipeline_mode = #tpu.pipeline_mode<synchronous>, transform_indices = @transform_7, window_bounds = array<i64: 128, 128>}, {pipeline_mode = #tpu.pipeline_mode<synchronous>, transform_indices = @transform_8, window_bounds = array<i64: 128, 256>}, {transform_indices = @transform_9, window_bounds = array<i64: 2, 256>}]} {
    %c16 = arith.constant 16 : index
    %c0 = arith.constant 0 : index
    %0 = vector.load %arg5[%c16, %c0] : memref<32x256xf32, #tpu.memory_space<vmem>>, vector<16x4xf32>
    %c0_0 = arith.constant 0 : index
    %c0_1 = arith.constant 0 : index
    %c0_2 = arith.constant 0 : index
    %1 = vector.load %arg2[%c0_0, %c0_1, %c0_2] : memref<2x16x2xf32, #tpu.memory_space<vmem>>, vector<2x16x2xf32>
    %2 = vector.extract_strided_slice %1 {offsets = [0, 0, 0], sizes = [2, 16, 1], strides = [1, 1, 1]} : vector<2x16x2xf32> to vector<2x16x1xf32>
    %c0_3 = arith.constant 0 : index
    %c0_4 = arith.constant 0 : index
    %c0_5 = arith.constant 0 : index
    %3 = vector.load %arg6[%c0_3, %c0_4, %c0_5] : memref<2x128x128xbf16, #tpu.memory_space<vmem>>, vector<1x128x128xbf16>
    %4 = vector.shape_cast %3 : vector<1x128x128xbf16> to vector<128x128xbf16>
    %c0_6 = arith.constant 0 : index
    %c0_7 = arith.constant 0 : index
    %5 = vector.load %arg5[%c0_6, %c0_7] : memref<32x256xf32, #tpu.memory_space<vmem>>, vector<1x128xf32>
    %c1 = arith.constant 1 : index
    %c0_8 = arith.constant 0 : index
    %6 = vector.load %arg5[%c1, %c0_8] : memref<32x256xf32, #tpu.memory_space<vmem>>, vector<1x128xf32>
    %7 = vector.extract_strided_slice %0 {offsets = [10, 0], sizes = [1, 1], strides = [1, 1]} : vector<16x4xf32> to vector<1x1xf32>
    %8 = vector.extract_strided_slice %1 {offsets = [0, 0, 1], sizes = [2, 16, 1], strides = [1, 1, 1]} : vector<2x16x2xf32> to vector<2x16x1xf32>
    %c0_9 = arith.constant 0 : index
    %c0_10 = arith.constant 0 : index
    %c0_11 = arith.constant 0 : index
    %9 = vector.load %arg1[%c0_9, %c0_10, %c0_11] : memref<2x16x128xbf16, #tpu.memory_space<vmem>>, vector<2x16x128xbf16>
    %10 = vector.shape_cast %9 : vector<2x16x128xbf16> to vector<32x128xbf16>
    %cst = arith.constant dense<0.000000e+00> : vector<32x128xf32>
    %11 = tpu.matmul %10, %4, %cst {dimension_numbers = #tpu.dot_dimension_numbers<[1], [0], [0], [1], [0, 0, 1, 1], [], []>} : vector<32x128xbf16>, vector<128x128xbf16>, vector<32x128xf32> -> vector<32x128xf32>
    %12 = vector.broadcast %5 : vector<1x128xf32> to vector<32x128xf32>
    %13 = arith.addf %11, %12 : vector<32x128xf32>
    %cst_12 = arith.constant 5.000000e-01 : f32
    %14 = vector.broadcast %cst_12 : f32 to vector<32x128xf32>
    %15 = arith.mulf %14, %13 : vector<32x128xf32>
    %cst_13 = arith.constant 4.471500e-02 : f32
    %16 = vector.broadcast %cst_13 : f32 to vector<32x128xf32>
    %17 = arith.mulf %16, %13 : vector<32x128xf32>
    %18 = arith.mulf %17, %13 : vector<32x128xf32>
    %19 = arith.mulf %18, %13 : vector<32x128xf32>
    %20 = arith.addf %13, %19 : vector<32x128xf32>
    %cst_14 = arith.constant 0.797884583 : f32
    %21 = vector.broadcast %cst_14 : f32 to vector<32x128xf32>
    %22 = arith.mulf %21, %20 : vector<32x128xf32>
    %23 = math.tanh %22 : vector<32x128xf32>
    %cst_15 = arith.constant 1.000000e+00 : f32
    %24 = vector.broadcast %cst_15 : f32 to vector<32x128xf32>
    %25 = arith.addf %24, %23 : vector<32x128xf32>
    %26 = arith.mulf %15, %25 : vector<32x128xf32>
    %27 = vector.broadcast %6 : vector<1x128xf32> to vector<32x128xf32>
    %28 = arith.mulf %26, %27 : vector<32x128xf32>
    %cst_16 = arith.constant dense<0.000000e+00> : vector<32xf32>
    %29 = vector.multi_reduction <add>, %28, %cst_16 [1] : vector<32x128xf32> to vector<32xf32>
    %30 = vector.shape_cast %29 : vector<32xf32> to vector<32x1xf32>
    %31 = vector.broadcast %7 : vector<1x1xf32> to vector<32x1xf32>
    %32 = arith.addf %30, %31 : vector<32x1xf32>
    %33 = vector.shape_cast %32 : vector<32x1xf32> to vector<2x16x1xf32>
    %cst_17 = arith.constant 5.000000e-01 : f32
    %34 = vector.broadcast %cst_17 : f32 to vector<2x16x1xf32>
    %35 = arith.cmpf ogt, %2, %34 : vector<2x16x1xf32>
    %cst_18 = arith.constant -1.000000e+09 : f32
    %36 = vector.broadcast %cst_18 : f32 to vector<2x16x1xf32>
    %37 = arith.select %35, %33, %36 : vector<2x16x1xi1>, vector<2x16x1xf32>
    %38 = vector.extract_strided_slice %0 {offsets = [2, 0], sizes = [1, 4], strides = [1, 1]} : vector<16x4xf32> to vector<1x4xf32>
    %39 = vector.extract_strided_slice %0 {offsets = [0, 0], sizes = [1, 4], strides = [1, 1]} : vector<16x4xf32> to vector<1x4xf32>
    %40 = vector.shape_cast %39 : vector<1x4xf32> to vector<1x1x4xf32>
    %41 = vector.broadcast %37 : vector<2x16x1xf32> to vector<2x16x4xf32>
    %42 = vector.broadcast %40 : vector<1x1x4xf32> to vector<2x16x4xf32>
    %43 = arith.mulf %41, %42 : vector<2x16x4xf32>
    %44 = vector.shape_cast %38 : vector<1x4xf32> to vector<1x1x4xf32>
    %45 = vector.broadcast %44 : vector<1x1x4xf32> to vector<2x16x4xf32>
    %46 = arith.addf %45, %43 : vector<2x16x4xf32>
    %47 = vector.extract_strided_slice %0 {offsets = [1, 0], sizes = [1, 4], strides = [1, 1]} : vector<16x4xf32> to vector<1x4xf32>
    %48 = vector.shape_cast %47 : vector<1x4xf32> to vector<1x1x4xf32>
    %49 = vector.broadcast %8 : vector<2x16x1xf32> to vector<2x16x4xf32>
    %50 = vector.broadcast %48 : vector<1x1x4xf32> to vector<2x16x4xf32>
    %51 = arith.mulf %49, %50 : vector<2x16x4xf32>
    %52 = arith.addf %46, %51 : vector<2x16x4xf32>
    %cst_19 = arith.constant 5.000000e-01 : f32
    %53 = vector.broadcast %cst_19 : f32 to vector<2x16x4xf32>
    %54 = arith.mulf %53, %52 : vector<2x16x4xf32>
    %cst_20 = arith.constant 4.471500e-02 : f32
    %55 = vector.broadcast %cst_20 : f32 to vector<2x16x4xf32>
    %56 = arith.mulf %55, %52 : vector<2x16x4xf32>
    %57 = arith.mulf %56, %52 : vector<2x16x4xf32>
    %58 = arith.mulf %57, %52 : vector<2x16x4xf32>
    %59 = arith.addf %52, %58 : vector<2x16x4xf32>
    %cst_21 = arith.constant 0.797884583 : f32
    %60 = vector.broadcast %cst_21 : f32 to vector<2x16x4xf32>
    %61 = arith.mulf %60, %59 : vector<2x16x4xf32>
    %62 = math.tanh %61 : vector<2x16x4xf32>
    %cst_22 = arith.constant 1.000000e+00 : f32
    %63 = vector.broadcast %cst_22 : f32 to vector<2x16x4xf32>
    %64 = arith.addf %63, %62 : vector<2x16x4xf32>
    %65 = arith.mulf %54, %64 : vector<2x16x4xf32>
    %66 = vector.extract_strided_slice %0 {offsets = [7, 0], sizes = [1, 4], strides = [1, 1]} : vector<16x4xf32> to vector<1x4xf32>
    %67 = vector.extract_strided_slice %65 {offsets = [0, 0, 0], sizes = [2, 16, 1], strides = [1, 1, 1]} : vector<2x16x4xf32> to vector<2x16x1xf32>
    %68 = vector.extract_strided_slice %0 {offsets = [3, 0], sizes = [1, 4], strides = [1, 1]} : vector<16x4xf32> to vector<1x4xf32>
    %69 = vector.shape_cast %68 : vector<1x4xf32> to vector<1x1x4xf32>
    %70 = vector.broadcast %67 : vector<2x16x1xf32> to vector<2x16x4xf32>
    %71 = vector.broadcast %69 : vector<1x1x4xf32> to vector<2x16x4xf32>
    %72 = arith.mulf %70, %71 : vector<2x16x4xf32>
    %73 = vector.shape_cast %66 : vector<1x4xf32> to vector<1x1x4xf32>
    %74 = vector.broadcast %73 : vector<1x1x4xf32> to vector<2x16x4xf32>
    %75 = arith.addf %74, %72 : vector<2x16x4xf32>
    %76 = vector.extract_strided_slice %65 {offsets = [0, 0, 1], sizes = [2, 16, 1], strides = [1, 1, 1]} : vector<2x16x4xf32> to vector<2x16x1xf32>
    %77 = vector.extract_strided_slice %0 {offsets = [4, 0], sizes = [1, 4], strides = [1, 1]} : vector<16x4xf32> to vector<1x4xf32>
    %78 = vector.shape_cast %77 : vector<1x4xf32> to vector<1x1x4xf32>
    %79 = vector.broadcast %76 : vector<2x16x1xf32> to vector<2x16x4xf32>
    %80 = vector.broadcast %78 : vector<1x1x4xf32> to vector<2x16x4xf32>
    %81 = arith.mulf %79, %80 : vector<2x16x4xf32>
    %82 = arith.addf %75, %81 : vector<2x16x4xf32>
    %83 = vector.extract_strided_slice %65 {offsets = [0, 0, 2], sizes = [2, 16, 1], strides = [1, 1, 1]} : vector<2x16x4xf32> to vector<2x16x1xf32>
    %84 = vector.extract_strided_slice %0 {offsets = [5, 0], sizes = [1, 4], strides = [1, 1]} : vector<16x4xf32> to vector<1x4xf32>
    %85 = vector.shape_cast %84 : vector<1x4xf32> to vector<1x1x4xf32>
    %86 = vector.broadcast %83 : vector<2x16x1xf32> to vector<2x16x4xf32>
    %87 = vector.broadcast %85 : vector<1x1x4xf32> to vector<2x16x4xf32>
    %88 = arith.mulf %86, %87 : vector<2x16x4xf32>
    %89 = arith.addf %82, %88 : vector<2x16x4xf32>
    %90 = vector.extract_strided_slice %65 {offsets = [0, 0, 3], sizes = [2, 16, 1], strides = [1, 1, 1]} : vector<2x16x4xf32> to vector<2x16x1xf32>
    %91 = vector.extract_strided_slice %0 {offsets = [6, 0], sizes = [1, 4], strides = [1, 1]} : vector<16x4xf32> to vector<1x4xf32>
    %92 = vector.shape_cast %91 : vector<1x4xf32> to vector<1x1x4xf32>
    %93 = vector.broadcast %90 : vector<2x16x1xf32> to vector<2x16x4xf32>
    %94 = vector.broadcast %92 : vector<1x1x4xf32> to vector<2x16x4xf32>
    %95 = arith.mulf %93, %94 : vector<2x16x4xf32>
    %96 = arith.addf %89, %95 : vector<2x16x4xf32>
    %cst_23 = arith.constant 5.000000e-01 : f32
    %97 = vector.broadcast %cst_23 : f32 to vector<2x16x4xf32>
    %98 = arith.mulf %97, %96 : vector<2x16x4xf32>
    %cst_24 = arith.constant 4.471500e-02 : f32
    %99 = vector.broadcast %cst_24 : f32 to vector<2x16x4xf32>
    %100 = arith.mulf %99, %96 : vector<2x16x4xf32>
    %101 = arith.mulf %100, %96 : vector<2x16x4xf32>
    %102 = arith.mulf %101, %96 : vector<2x16x4xf32>
    %103 = arith.addf %96, %102 : vector<2x16x4xf32>
    %cst_25 = arith.constant 0.797884583 : f32
    %104 = vector.broadcast %cst_25 : f32 to vector<2x16x4xf32>
    %105 = arith.mulf %104, %103 : vector<2x16x4xf32>
    %106 = math.tanh %105 : vector<2x16x4xf32>
    %cst_26 = arith.constant 1.000000e+00 : f32
    %107 = vector.broadcast %cst_26 : f32 to vector<2x16x4xf32>
    %108 = arith.addf %107, %106 : vector<2x16x4xf32>
    %109 = arith.mulf %98, %108 : vector<2x16x4xf32>
    %110 = vector.extract_strided_slice %0 {offsets = [9, 0], sizes = [1, 1], strides = [1, 1]} : vector<16x4xf32> to vector<1x1xf32>
    %111 = vector.extract_strided_slice %109 {offsets = [0, 0, 0], sizes = [2, 16, 1], strides = [1, 1, 1]} : vector<2x16x4xf32> to vector<2x16x1xf32>
    %112 = vector.extract_strided_slice %0 {offsets = [8, 0], sizes = [1, 1], strides = [1, 1]} : vector<16x4xf32> to vector<1x1xf32>
    %113 = vector.shape_cast %112 : vector<1x1xf32> to vector<1x1x1xf32>
    %114 = vector.broadcast %113 : vector<1x1x1xf32> to vector<2x16x1xf32>
    %115 = arith.mulf %111, %114 : vector<2x16x1xf32>
    %116 = vector.shape_cast %110 : vector<1x1xf32> to vector<1x1x1xf32>
    %117 = vector.broadcast %116 : vector<1x1x1xf32> to vector<2x16x1xf32>
    %118 = arith.addf %117, %115 : vector<2x16x1xf32>
    %119 = vector.extract_strided_slice %109 {offsets = [0, 0, 1], sizes = [2, 16, 1], strides = [1, 1, 1]} : vector<2x16x4xf32> to vector<2x16x1xf32>
    %120 = vector.extract_strided_slice %0 {offsets = [8, 1], sizes = [1, 1], strides = [1, 1]} : vector<16x4xf32> to vector<1x1xf32>
    %121 = vector.shape_cast %120 : vector<1x1xf32> to vector<1x1x1xf32>
    %122 = vector.broadcast %121 : vector<1x1x1xf32> to vector<2x16x1xf32>
    %123 = arith.mulf %119, %122 : vector<2x16x1xf32>
    %124 = arith.addf %118, %123 : vector<2x16x1xf32>
    %125 = vector.extract_strided_slice %109 {offsets = [0, 0, 2], sizes = [2, 16, 1], strides = [1, 1, 1]} : vector<2x16x4xf32> to vector<2x16x1xf32>
    %126 = vector.extract_strided_slice %0 {offsets = [8, 2], sizes = [1, 1], strides = [1, 1]} : vector<16x4xf32> to vector<1x1xf32>
    %127 = vector.shape_cast %126 : vector<1x1xf32> to vector<1x1x1xf32>
    %128 = vector.broadcast %127 : vector<1x1x1xf32> to vector<2x16x1xf32>
    %129 = arith.mulf %125, %128 : vector<2x16x1xf32>
    %130 = arith.addf %124, %129 : vector<2x16x1xf32>
    %131 = vector.extract_strided_slice %109 {offsets = [0, 0, 3], sizes = [2, 16, 1], strides = [1, 1, 1]} : vector<2x16x4xf32> to vector<2x16x1xf32>
    %132 = vector.extract_strided_slice %0 {offsets = [8, 3], sizes = [1, 1], strides = [1, 1]} : vector<16x4xf32> to vector<1x1xf32>
    %133 = vector.shape_cast %132 : vector<1x1xf32> to vector<1x1x1xf32>
    %134 = vector.broadcast %133 : vector<1x1x1xf32> to vector<2x16x1xf32>
    %135 = arith.mulf %131, %134 : vector<2x16x1xf32>
    %136 = arith.addf %130, %135 : vector<2x16x1xf32>
    %137 = arith.negf %136 : vector<2x16x1xf32>
    %138 = math.exp %137 : vector<2x16x1xf32>
    %cst_27 = arith.constant 1.000000e+00 : f32
    %139 = vector.broadcast %cst_27 : f32 to vector<2x16x1xf32>
    %140 = arith.addf %139, %138 : vector<2x16x1xf32>
    %141 = arith.divf %139, %140 : vector<2x16x1xf32>
    %142 = arith.mulf %37, %141 : vector<2x16x1xf32>
    %cst_28 = arith.constant dense<0xFF800000> : vector<2x1xf32>
    %143 = vector.multi_reduction <maximumf>, %142, %cst_28 [1] : vector<2x16x1xf32> to vector<2x1xf32>
    %144 = vector.shape_cast %143 : vector<2x1xf32> to vector<2x1x1xf32>
    %145 = vector.broadcast %144 : vector<2x1x1xf32> to vector<2x16x1xf32>
    %146 = arith.subf %142, %145 : vector<2x16x1xf32>
    %147 = math.exp %146 : vector<2x16x1xf32>
    %cst_29 = arith.constant dense<0.000000e+00> : vector<2x1xf32>
    %148 = vector.multi_reduction <add>, %147, %cst_29 [1] : vector<2x16x1xf32> to vector<2x1xf32>
    %149 = vector.shape_cast %148 : vector<2x1xf32> to vector<2x1x1xf32>
    %150 = tpu.reciprocal %149 {approx = true} : vector<2x1x1xf32> -> vector<2x1x1xf32>
    %151 = vector.broadcast %150 : vector<2x1x1xf32> to vector<2x16x1xf32>
    %152 = arith.mulf %147, %151 : vector<2x16x1xf32>
    %153 = arith.extf %9 : vector<2x16x128xbf16> to vector<2x16x128xf32>
    %154 = vector.broadcast %152 : vector<2x16x1xf32> to vector<2x16x128xf32>
    %155 = arith.mulf %154, %153 : vector<2x16x128xf32>
    %cst_30 = arith.constant dense<0.000000e+00> : vector<2x128xf32>
    %156 = vector.multi_reduction <add>, %155, %cst_30 [1] : vector<2x16x128xf32> to vector<2x128xf32>
    %c0_31 = arith.constant 0 : index
    %c0_32 = arith.constant 0 : index
    %c0_33 = arith.constant 0 : index
    %157 = vector.load %arg4[%c0_31, %c0_32, %c0_33] : memref<2x8x1xf32, #tpu.memory_space<vmem>>, vector<2x8x1xf32>
    %c1_34 = arith.constant 1 : index
    %c0_35 = arith.constant 0 : index
    %c0_36 = arith.constant 0 : index
    %158 = vector.load %arg6[%c1_34, %c0_35, %c0_36] : memref<2x128x128xbf16, #tpu.memory_space<vmem>>, vector<1x128x128xbf16>
    %159 = vector.shape_cast %158 : vector<1x128x128xbf16> to vector<128x128xbf16>
    %c2 = arith.constant 2 : index
    %c0_37 = arith.constant 0 : index
    %160 = vector.load %arg5[%c2, %c0_37] : memref<32x256xf32, #tpu.memory_space<vmem>>, vector<1x128xf32>
    %c3 = arith.constant 3 : index
    %c0_38 = arith.constant 0 : index
    %161 = vector.load %arg5[%c3, %c0_38] : memref<32x256xf32, #tpu.memory_space<vmem>>, vector<1x128xf32>
    %162 = vector.extract_strided_slice %0 {offsets = [10, 1], sizes = [1, 1], strides = [1, 1]} : vector<16x4xf32> to vector<1x1xf32>
    %c0_39 = arith.constant 0 : index
    %c0_40 = arith.constant 0 : index
    %c0_41 = arith.constant 0 : index
    %163 = vector.load %arg3[%c0_39, %c0_40, %c0_41] : memref<2x8x128xbf16, #tpu.memory_space<vmem>>, vector<2x8x128xbf16>
    %164 = vector.shape_cast %163 : vector<2x8x128xbf16> to vector<16x128xbf16>
    %cst_42 = arith.constant dense<0.000000e+00> : vector<16x128xf32>
    %165 = tpu.matmul %164, %159, %cst_42 {dimension_numbers = #tpu.dot_dimension_numbers<[1], [0], [0], [1], [0, 0, 1, 1], [], []>} : vector<16x128xbf16>, vector<128x128xbf16>, vector<16x128xf32> -> vector<16x128xf32>
    %166 = vector.broadcast %160 : vector<1x128xf32> to vector<16x128xf32>
    %167 = arith.addf %165, %166 : vector<16x128xf32>
    %cst_43 = arith.constant 5.000000e-01 : f32
    %168 = vector.broadcast %cst_43 : f32 to vector<16x128xf32>
    %169 = arith.mulf %168, %167 : vector<16x128xf32>
    %cst_44 = arith.constant 4.471500e-02 : f32
    %170 = vector.broadcast %cst_44 : f32 to vector<16x128xf32>
    %171 = arith.mulf %170, %167 : vector<16x128xf32>
    %172 = arith.mulf %171, %167 : vector<16x128xf32>
    %173 = arith.mulf %172, %167 : vector<16x128xf32>
    %174 = arith.addf %167, %173 : vector<16x128xf32>
    %cst_45 = arith.constant 0.797884583 : f32
    %175 = vector.broadcast %cst_45 : f32 to vector<16x128xf32>
    %176 = arith.mulf %175, %174 : vector<16x128xf32>
    %177 = math.tanh %176 : vector<16x128xf32>
    %cst_46 = arith.constant 1.000000e+00 : f32
    %178 = vector.broadcast %cst_46 : f32 to vector<16x128xf32>
    %179 = arith.addf %178, %177 : vector<16x128xf32>
    %180 = arith.mulf %169, %179 : vector<16x128xf32>
    %181 = vector.broadcast %161 : vector<1x128xf32> to vector<16x128xf32>
    %182 = arith.mulf %180, %181 : vector<16x128xf32>
    %cst_47 = arith.constant dense<0.000000e+00> : vector<16xf32>
    %183 = vector.multi_reduction <add>, %182, %cst_47 [1] : vector<16x128xf32> to vector<16xf32>
    %184 = vector.shape_cast %183 : vector<16xf32> to vector<16x1xf32>
    %185 = vector.broadcast %162 : vector<1x1xf32> to vector<16x1xf32>
    %186 = arith.addf %184, %185 : vector<16x1xf32>
    %187 = vector.shape_cast %186 : vector<16x1xf32> to vector<2x8x1xf32>
    %cst_48 = arith.constant 5.000000e-01 : f32
    %188 = vector.broadcast %cst_48 : f32 to vector<2x8x1xf32>
    %189 = arith.cmpf ogt, %157, %188 : vector<2x8x1xf32>
    %cst_49 = arith.constant -1.000000e+09 : f32
    %190 = vector.broadcast %cst_49 : f32 to vector<2x8x1xf32>
    %191 = arith.select %189, %187, %190 : vector<2x8x1xi1>, vector<2x8x1xf32>
    %cst_50 = arith.constant dense<0xFF800000> : vector<2x1xf32>
    %192 = vector.multi_reduction <maximumf>, %191, %cst_50 [1] : vector<2x8x1xf32> to vector<2x1xf32>
    %193 = vector.shape_cast %192 : vector<2x1xf32> to vector<2x1x1xf32>
    %194 = vector.broadcast %193 : vector<2x1x1xf32> to vector<2x8x1xf32>
    %195 = arith.subf %191, %194 : vector<2x8x1xf32>
    %196 = math.exp %195 : vector<2x8x1xf32>
    %cst_51 = arith.constant dense<0.000000e+00> : vector<2x1xf32>
    %197 = vector.multi_reduction <add>, %196, %cst_51 [1] : vector<2x8x1xf32> to vector<2x1xf32>
    %198 = vector.shape_cast %197 : vector<2x1xf32> to vector<2x1x1xf32>
    %199 = tpu.reciprocal %198 {approx = true} : vector<2x1x1xf32> -> vector<2x1x1xf32>
    %200 = vector.broadcast %199 : vector<2x1x1xf32> to vector<2x8x1xf32>
    %201 = arith.mulf %196, %200 : vector<2x8x1xf32>
    %202 = arith.extf %163 : vector<2x8x128xbf16> to vector<2x8x128xf32>
    %203 = vector.broadcast %201 : vector<2x8x1xf32> to vector<2x8x128xf32>
    %204 = arith.mulf %203, %202 : vector<2x8x128xf32>
    %cst_52 = arith.constant dense<0.000000e+00> : vector<2x128xf32>
    %205 = vector.multi_reduction <add>, %204, %cst_52 [1] : vector<2x8x128xf32> to vector<2x128xf32>
    %206 = tpu.concatenate %156, %205 in 1 : vector<2x128xf32>, vector<2x128xf32> -> vector<2x256xf32>
    %207 = arith.truncf %206 : vector<2x256xf32> to vector<2x256xbf16>
    %c0_53 = arith.constant 0 : index
    %c0_54 = arith.constant 0 : index
    %208 = vector.load %arg7[%c0_53, %c0_54] : memref<256x128xbf16, #tpu.memory_space<vmem>>, vector<256x128xbf16>
    %cst_55 = arith.constant dense<0.000000e+00> : vector<2x128xf32>
    %209 = tpu.matmul %207, %208, %cst_55 {dimension_numbers = #tpu.dot_dimension_numbers<[1], [0], [0], [1], [0, 0, 1, 1], [], []>} : vector<2x256xbf16>, vector<256x128xbf16>, vector<2x128xf32> -> vector<2x128xf32>
    %c4 = arith.constant 4 : index
    %c0_56 = arith.constant 0 : index
    %210 = vector.load %arg5[%c4, %c0_56] : memref<32x256xf32, #tpu.memory_space<vmem>>, vector<1x128xf32>
    %211 = vector.broadcast %210 : vector<1x128xf32> to vector<2x128xf32>
    %212 = arith.addf %209, %211 : vector<2x128xf32>
    %cst_57 = arith.constant dense<0.000000e+00> : vector<2xf32>
    %213 = vector.multi_reduction <add>, %212, %cst_57 [1] : vector<2x128xf32> to vector<2xf32>
    %214 = vector.shape_cast %213 : vector<2xf32> to vector<2x1xf32>
    %cst_58 = arith.constant 1.280000e+02 : f32
    %215 = vector.broadcast %cst_58 : f32 to vector<2x1xf32>
    %216 = arith.divf %214, %215 : vector<2x1xf32>
    %217 = vector.broadcast %216 : vector<2x1xf32> to vector<2x128xf32>
    %218 = arith.subf %212, %217 : vector<2x128xf32>
    %219 = arith.mulf %218, %218 : vector<2x128xf32>
    %cst_59 = arith.constant dense<0.000000e+00> : vector<2xf32>
    %220 = vector.multi_reduction <add>, %219, %cst_59 [1] : vector<2x128xf32> to vector<2xf32>
    %221 = vector.shape_cast %220 : vector<2xf32> to vector<2x1xf32>
    %cst_60 = arith.constant 1.280000e+02 : f32
    %222 = vector.broadcast %cst_60 : f32 to vector<2x1xf32>
    %223 = arith.divf %221, %222 : vector<2x1xf32>
    %224 = vector.broadcast %216 : vector<2x1xf32> to vector<2x128xf32>
    %225 = arith.subf %212, %224 : vector<2x128xf32>
    %cst_61 = arith.constant 9.99999974E-6 : f32
    %226 = vector.broadcast %cst_61 : f32 to vector<2x1xf32>
    %227 = arith.addf %223, %226 : vector<2x1xf32>
    %228 = math.rsqrt %227 : vector<2x1xf32>
    %229 = vector.broadcast %228 : vector<2x1xf32> to vector<2x128xf32>
    %230 = arith.mulf %225, %229 : vector<2x128xf32>
    %c5 = arith.constant 5 : index
    %c0_62 = arith.constant 0 : index
    %231 = vector.load %arg5[%c5, %c0_62] : memref<32x256xf32, #tpu.memory_space<vmem>>, vector<1x128xf32>
    %232 = vector.broadcast %231 : vector<1x128xf32> to vector<2x128xf32>
    %233 = arith.mulf %230, %232 : vector<2x128xf32>
    %c6 = arith.constant 6 : index
    %c0_63 = arith.constant 0 : index
    %234 = vector.load %arg5[%c6, %c0_63] : memref<32x256xf32, #tpu.memory_space<vmem>>, vector<1x128xf32>
    %235 = vector.broadcast %234 : vector<1x128xf32> to vector<2x128xf32>
    %236 = arith.addf %233, %235 : vector<2x128xf32>
    %237 = arith.truncf %236 : vector<2x128xf32> to vector<2x128xbf16>
    %c0_64 = arith.constant 0 : index
    %c0_65 = arith.constant 0 : index
    %238 = vector.load %arg8[%c0_64, %c0_65] : memref<128x128xbf16, #tpu.memory_space<vmem>>, vector<128x128xbf16>
    %cst_66 = arith.constant dense<0.000000e+00> : vector<2x128xf32>
    %239 = tpu.matmul %237, %238, %cst_66 {dimension_numbers = #tpu.dot_dimension_numbers<[1], [0], [0], [1], [0, 0, 1, 1], [], []>} : vector<2x128xbf16>, vector<128x128xbf16>, vector<2x128xf32> -> vector<2x128xf32>
    %c7 = arith.constant 7 : index
    %c0_67 = arith.constant 0 : index
    %240 = vector.load %arg5[%c7, %c0_67] : memref<32x256xf32, #tpu.memory_space<vmem>>, vector<1x128xf32>
    %241 = vector.broadcast %240 : vector<1x128xf32> to vector<2x128xf32>
    %242 = arith.addf %239, %241 : vector<2x128xf32>
    %cst_68 = arith.constant 5.000000e-01 : f32
    %243 = vector.broadcast %cst_68 : f32 to vector<2x128xf32>
    %244 = arith.mulf %243, %242 : vector<2x128xf32>
    %cst_69 = arith.constant 4.471500e-02 : f32
    %245 = vector.broadcast %cst_69 : f32 to vector<2x128xf32>
    %246 = arith.mulf %245, %242 : vector<2x128xf32>
    %247 = arith.mulf %246, %242 : vector<2x128xf32>
    %248 = arith.mulf %247, %242 : vector<2x128xf32>
    %249 = arith.addf %242, %248 : vector<2x128xf32>
    %cst_70 = arith.constant 0.797884583 : f32
    %250 = vector.broadcast %cst_70 : f32 to vector<2x128xf32>
    %251 = arith.mulf %250, %249 : vector<2x128xf32>
    %252 = math.tanh %251 : vector<2x128xf32>
    %cst_71 = arith.constant 1.000000e+00 : f32
    %253 = vector.broadcast %cst_71 : f32 to vector<2x128xf32>
    %254 = arith.addf %253, %252 : vector<2x128xf32>
    %255 = arith.mulf %244, %254 : vector<2x128xf32>
    %256 = arith.truncf %255 : vector<2x128xf32> to vector<2x128xbf16>
    %c0_72 = arith.constant 0 : index
    %c0_73 = arith.constant 0 : index
    %257 = vector.load %arg9[%c0_72, %c0_73] : memref<128x256xbf16, #tpu.memory_space<vmem>>, vector<128x256xbf16>
    %cst_74 = arith.constant dense<0.000000e+00> : vector<2x256xf32>
    %258 = tpu.matmul %256, %257, %cst_74 {dimension_numbers = #tpu.dot_dimension_numbers<[1], [0], [0], [1], [0, 0, 1, 1], [], []>} : vector<2x128xbf16>, vector<128x256xbf16>, vector<2x256xf32> -> vector<2x256xf32>
    %c8 = arith.constant 8 : index
    %c0_75 = arith.constant 0 : index
    %259 = vector.load %arg5[%c8, %c0_75] : memref<32x256xf32, #tpu.memory_space<vmem>>, vector<1x256xf32>
    %260 = vector.broadcast %259 : vector<1x256xf32> to vector<2x256xf32>
    %261 = arith.addf %258, %260 : vector<2x256xf32>
    %c0_76 = arith.constant 0 : index
    %c0_77 = arith.constant 0 : index
    %262 = vector.load %arg10[%c0_76, %c0_77] : memref<2x256xf32, #tpu.memory_space<vmem>>, vector<2x256xf32>
    tpu.vector_store %arg10[%c0_76, %c0_77], %261 {strides = array<i32>} : memref<2x256xf32, #tpu.memory_space<vmem>>, vector<2x256xf32>,
    return
  }
  func.func @transform_0(%arg0: i32) -> (i32, i32, i32) {
    %c0_i32 = arith.constant 0 : i32
    %c0_i32_0 = arith.constant 0 : i32
    %c0_i32_1 = arith.constant 0 : i32
    return %arg0, %c0_i32, %c0_i32_0 : i32, i32, i32
  }
  func.func @transform_1(%arg0: i32) -> (i32, i32, i32) {
    %c0_i32 = arith.constant 0 : i32
    %c0_i32_0 = arith.constant 0 : i32
    %c0_i32_1 = arith.constant 0 : i32
    return %arg0, %c0_i32, %c0_i32_0 : i32, i32, i32
  }
  func.func @transform_2(%arg0: i32) -> (i32, i32, i32) {
    %c0_i32 = arith.constant 0 : i32
    %c0_i32_0 = arith.constant 0 : i32
    %c0_i32_1 = arith.constant 0 : i32
    return %arg0, %c0_i32, %c0_i32_0 : i32, i32, i32
  }
  func.func @transform_3(%arg0: i32) -> (i32, i32, i32) {
    %c0_i32 = arith.constant 0 : i32
    %c0_i32_0 = arith.constant 0 : i32
    %c0_i32_1 = arith.constant 0 : i32
    return %arg0, %c0_i32, %c0_i32_0 : i32, i32, i32
  }
  func.func @transform_4(%arg0: i32) -> (i32, i32) {
    %c0_i32 = arith.constant 0 : i32
    %c0_i32_0 = arith.constant 0 : i32
    %c0_i32_1 = arith.constant 0 : i32
    return %c0_i32, %c0_i32_0 : i32, i32
  }
  func.func @transform_5(%arg0: i32) -> (i32, i32, i32) {
    %c0_i32 = arith.constant 0 : i32
    %c0_i32_0 = arith.constant 0 : i32
    %c0_i32_1 = arith.constant 0 : i32
    %c0_i32_2 = arith.constant 0 : i32
    return %c0_i32, %c0_i32_0, %c0_i32_1 : i32, i32, i32
  }
  func.func @transform_6(%arg0: i32) -> (i32, i32) {
    %c0_i32 = arith.constant 0 : i32
    %c0_i32_0 = arith.constant 0 : i32
    %c0_i32_1 = arith.constant 0 : i32
    return %c0_i32, %c0_i32_0 : i32, i32
  }
  func.func @transform_7(%arg0: i32) -> (i32, i32) {
    %c0_i32 = arith.constant 0 : i32
    %c0_i32_0 = arith.constant 0 : i32
    %c0_i32_1 = arith.constant 0 : i32
    return %c0_i32, %c0_i32_0 : i32, i32
  }
  func.func @transform_8(%arg0: i32) -> (i32, i32) {
    %c0_i32 = arith.constant 0 : i32
    %c0_i32_0 = arith.constant 0 : i32
    %c0_i32_1 = arith.constant 0 : i32
    return %c0_i32, %c0_i32_0 : i32, i32
  }
  func.func @transform_9(%arg0: i32) -> (i32, i32) {
    %c0_i32 = arith.constant 0 : i32
    %c0_i32_0 = arith.constant 0 : i32
    return %arg0, %c0_i32 : i32, i32
  }
}

</mosaic_0001>

<bundles_post_ra>
// kernel: tpu_custom_call.1
= control target key start
LH: loop header
LB: loop body
LE: loop exit
PB: predicated region body
PF: predicated region fallthrough
CT: control target
= control target key end

     0   :  { %14 = vsyncpa [#allocation3], 0  ;;  %s2213_s0 = inlined_call_operand.vmem [shape: bf16[2,16,128], index: 0, kind: input, shape index: {}]   ;;  %s2214_s1 = inlined_call_operand.vmem [shape: f32[2,16,2], index: 1, kind: input, shape index: {}]   ;;  %s2215_s2 = inlined_call_operand.vmem [shape: bf16[2,8,128], index: 2, kind: input, shape index: {}]   ;;  %s2216_s3 = inlined_call_operand.vmem [shape: f32[2,8,1], index: 3, kind: input, shape index: {}]   ;;  %s2217_s4 = inlined_call_operand.hbm [shape: f32[32,256], index: 4, kind: input, shape index: {}]   ;;  %s2218_s5 = inlined_call_operand.hbm [shape: bf16[2,128,128], index: 5, kind: input, shape index: {}]   ;;  %s2219_s6 = inlined_call_operand.hbm [shape: bf16[256,128], index: 6, kind: input, shape index: {}]   ;;  %s2220_s7 = inlined_call_operand.hbm [shape: bf16[128,128], index: 7, kind: input, shape index: {}]   ;;  %s2221_s8 = inlined_call_operand.hbm [shape: bf16[128,256], index: 8, kind: input, shape index: {}]   ;;  %s2222_s9 = inlined_call_operand.hbm [shape: f32[2,256], index: 9, kind: output, shape index: {}]  }
   0x1   :  { %15 = vsyncpa [#allocation6], 0 }
   0x2   :  { %16 = vsyncpa [#allocation9], 0  ;;  %s43_s11 = sshll.u32 %s2218_s5, 4  ;;  %s44_s11 = int_to_ptr.hbm [resolvable:$true] %s43_s11 }
   0x3   :  { %17 = vsyncpa [#allocation4], 0  ;;  %s1952_s12 = smov [#allocation5]   ;;  %s69_s16 = sshll.u32 %s2220_s7, 4  ;;  %s70_s16 = int_to_ptr.hbm [resolvable:$true] %s69_s16 }
   0x4   :  { %s45_s13 = sshll.u32 %s1952_s12, 4  ;;  %s1953_s17 = smov 64   ;;  %s46_s13 = int_to_ptr.vmem [resolvable:$true] %s45_s13 }
   0x5   :  { %s1954_s18 = smov 4   ;;  %s1955_s19 = smov [#allocation8]  }
   0x6   :  { %51 = dma.hbm_to_vmem [thread:$0]  %s44_s11, 2048, %s46_s13, [#allocation6], %s1953_s17, %s1953_s17, %s1954_s18  }
   0x7   :  { %s71_s20 = sshll.u32 %s1955_s19, 4  ;;  %s30_s23 = sshll.u32 %s2217_s4, 4  ;;  %s72_s20 = int_to_ptr.vmem [resolvable:$true] %s71_s20  ;;  %s31_s23 = int_to_ptr.hbm [resolvable:$true] %s30_s23 }
   0x8   :  { %77 = dma.hbm_to_vmem [thread:$0]  %s70_s16, 1024, %s72_s20, [#allocation9], %s1953_s17, %s1953_s17, %s1954_s18  }
   0x9   :  { %s1956_s5 = smov [#allocation2]   ;;  %s56_s7 = sshll.u32 %s2219_s6, 4  ;;  %s57_s7 = int_to_ptr.hbm [resolvable:$true] %s56_s7 }
   0xa   :  { %s32_s24 = sshll.u32 %s1956_s5, 4  ;;  %s1957_s27 = smov 256   ;;  %s33_s24 = int_to_ptr.vmem [resolvable:$true] %s32_s24 }
   0xb   :  { %s1958_s28 = smov 16   ;;  %s1959_s29 = smov [#allocation7]  }
   0xc   :  { %38 = dma.hbm_to_vmem [thread:$0]  %s31_s23, 1024, %s33_s24, [#allocation3], %s1957_s27, %s1957_s27, %s1958_s28  }
   0xd   :  { %s58_s30 = sshll.u32 %s1959_s29, 4  ;;  %s82_s4 = sshll.u32 %s2221_s8, 4  ;;  %s59_s30 = int_to_ptr.vmem [resolvable:$true] %s58_s30  ;;  %s83_s4 = int_to_ptr.hbm [resolvable:$true] %s82_s4 }
   0xe   :  { %64 = dma.hbm_to_vmem [thread:$0]  %s57_s7, 2048, %s59_s30, [#allocation6], %s1953_s17, %s1953_s17, %s1954_s18  }
   0xf   :  { %s1960_s12 = smov [#allocation10]   ;;  %s1961_s14 = smov 128  }
  0x10   :  { %s84_s13 = sshll.u32 %s1960_s12, 4  ;;  %s1962_s15 = smov 8   ;;  %s85_s13 = int_to_ptr.vmem [resolvable:$true] %s84_s13 }
  0x11   :  { %90 = dma.hbm_to_vmem [thread:$0]  %s83_s4, 2048, %s85_s13, [#allocation9], %s1961_s14, %s1961_s14, %s1962_s15  }
  0x12   :  { %1944 = dma.done.wait [#allocation3], 1024  }
  0x13   :  { %1945 = vsyncadd [#allocation3], 4294966272 }
  0x14   :  { %1946 = dma.done.wait [#allocation6], 4096  }
  0x15   :  { %1947 = vsyncadd [#allocation6], 4294963200 }
  0x16   :  { %1948 = dma.done.wait [#allocation9], 3072  }
  0x17   :  { %1949 = vsyncadd [#allocation9], 4294964224  ;;  %v1637_v0 = vld [vmem:[#allocation5 + $0x38] sm:$0xff]  ;;  %v1636_v1 = vld [vmem:[#allocation5 + $0x30] sm:$0xff]  ;;  %v1963_v60 = vmov 0   ;;  %s1967_s26 = smov 127  }
  0x18   :  { %199 = vmatpush.bf16.msra.mxu0 %v1637_v0  ;;  %v1635_v2 = vld [vmem:[#allocation5 + $0x28] sm:$0xff]  ;;  %v1634_v3 = vld [vmem:[#allocation5 + $0x20] sm:$0xff]  ;;  %v1633_v4 = vld [vmem:[#allocation5 + $0x18] sm:$0xff]  ;;  %1709 = vset.pattern.permute.xlu2 %v1963_v60  ;;  %s1968_s7 = smov 126   ;;  %s1969_s27 = smov 125   ;;  %vm657_vm12 = vcmask 7168  }
  0x19   :  { %v1632_v5 = vld [vmem:[#allocation5 + $0x10] sm:$0xff]  ;;  %v1631_v6 = vld [vmem:[#allocation5 + $0x8] sm:$0xff]  ;;  %v1630_v7 = vld [vmem:[#allocation5] sm:$0xff]  ;;  %1710 = vset.pattern.permute.xlu0 %v1963_v60  ;;  %1711 = vset.pattern.permute.xlu1 %v1963_v60  ;;  %s1378_s8 = sshll.u32 %s2222_s9, 4  ;;  %s1379_s8 = int_to_ptr.hbm [resolvable:$true] %s1378_s8 }
  0x1a   :  { %v1638_v8 = vld [vmem:[%s2213_s0] sm:$0xff]  ;;  %v1639_v9 = vld [vmem:[%s2213_s0 + $0x8] sm:$0xff]  ;;  %v2046_v61 = vld [vmem:[#allocation2 + $0x30] sm:$0xff] }
  0x1b   :  { %v133_v10 = vld [vmem:[#allocation2] ss:$0 sm:$0xff]  ;;  %v134_v31 = vld [vmem:[#allocation2 + $0x1] ss:$0 sm:$0xff]  ;;  %v2049_v62 = vperm.slane %v2046_v61, 2 }
  0x1c   :  { %200 = vmatpush.bf16.msra.mxu0 %v1636_v1  ;;  %v113_v63 = vld [vmem:[%s2214_s1] sm:$0xff] }
  0x1d   :  { %vm271_vm0 = vcmp.gt.f32.partialorder %v113_v63, 0.5 }
  0x20   :  { %201 = vmatpush.bf16.msra.mxu0 %v1635_v2 }
  0x24   :  { %202 = vmatpush.bf16.msra.mxu0 %v1634_v3  ;;  %v114_v3 = vld [vmem:[%s2214_s1 + $0x8] sm:$0xff] }
  0x25   :  { %vm272_vm1 = vcmp.gt.f32.partialorder %v114_v3, 0.5 }
  0x28   :  { %203 = vmatpush.bf16.msra.mxu0 %v1633_v4 }
  0x2c   :  { %204 = vmatpush.bf16.msra.mxu0 %v1632_v5 }
  0x30   :  { %205 = vmatpush.bf16.msra.mxu0 %v1631_v6 }
  0x34   :  { %206 = vmatpush.bf16.msra.mxu0 %v1630_v7  ;;  %v115_v7 = vld [vmem:[%s2214_s1 + $0x10] sm:$0xff] }
  0x35   :  { %vm273_vm2 = vcmp.gt.f32.partialorder %v115_v7, 0.5 }
  0x37   :  { %207 = vmatmul.bf16.vlgmr.msra.gmra.mxu0 %v1638_v8  ;;  %v1647_v8 = vld [vmem:[#allocation5 + $0x78] sm:$0xff] }
  0x38   :  { %831 = vmatpush.bf16.msra.mxu1 %v1647_v8 }
  0x47   :  { %212 = vmatmul.bf16.gmra.mxu0 %v1639_v9  ;;  %v1646_v9 = vld [vmem:[#allocation5 + $0x70] sm:$0xff] }
  0x48   :  { %832 = vmatpush.bf16.msra.mxu1 %v1646_v9  ;;  %v1965_v9 = vmov 3  }
  0xb4   :  { %v208_v11 = vpop.f32.mrf.mxu0 }
  0xb5   :  { %v209_v12 = vadd.f32 %v208_v11, %v133_v10 }
  0xb7   :  { %v222_v13 = vmul.f32 0.044715, %v209_v12  ;;  %v218_v29 = vmul.f32 0.5, %v209_v12 }
  0xb9   :  { %v226_v14 = vmul.f32 %v222_v13, %v209_v12  ;;  %v1645_v13 = vld [vmem:[#allocation5 + $0x68] sm:$0xff] }
  0xba   :  { %833 = vmatpush.bf16.msra.mxu1 %v1645_v13 }
  0xbb   :  { %v230_v15 = vmul.f32 %v226_v14, %v209_v12  ;;  %v1964_v14 = vmov 1  }
  0xbc   :  { %v210_v16 = vpop.f32.mrf.mxu0 }
  0xbd   :  { %v211_v17 = vadd.f32 %v210_v16, %v133_v10  ;;  %v234_v18 = vadd.f32 %v230_v15, %v209_v12  ;;  %v116_v15 = vld [vmem:[%s2214_s1 + $0x18] sm:$0xff]  ;;  %v1644_v16 = vld [vmem:[#allocation5 + $0x60] sm:$0xff] }
  0xbe   :  { %vm274_vm3 = vcmp.gt.f32.partialorder %v116_v15, 0.5  ;;  %834 = vmatpush.bf16.msra.mxu1 %v1644_v16 }
  0xbf   :  { %v223_v19 = vmul.f32 0.044715, %v211_v17  ;;  %v238_v20 = vmul.f32 0.7978846, %v234_v18  ;;  %v219_v42 = vmul.f32 0.5, %v211_v17 }
  0xc1   :  { %1730 = vtanh.f32 %v238_v20  ;;  %v227_v21 = vmul.f32 %v223_v19, %v211_v17  ;;  %v1643_v20 = vld [vmem:[#allocation5 + $0x58] sm:$0xff] }
  0xc2   :  { %835 = vmatpush.bf16.msra.mxu1 %v1643_v20 }
  0xc3   :  { %v231_v22 = vmul.f32 %v227_v21, %v211_v17  ;;  %v1642_v21 = vld [vmem:[#allocation5 + $0x50] sm:$0xff] }
  0xc4   :  { %v213_v23 = vpop.f32.mrf.mxu0 }
  0xc5   :  { %v214_v24 = vadd.f32 %v213_v23, %v133_v10  ;;  %v235_v25 = vadd.f32 %v231_v22, %v211_v17  ;;  %v1641_v22 = vld [vmem:[#allocation5 + $0x48] sm:$0xff]  ;;  %v1640_v23 = vld [vmem:[#allocation5 + $0x40] sm:$0xff] }
  0xc6   :  { %836 = vmatpush.bf16.msra.mxu1 %v1642_v21 }
  0xc7   :  { %v1731_v26 = vpop.eup %1730  ;;  %v239_v27 = vmul.f32 0.7978846, %v235_v25  ;;  %v224_v28 = vmul.f32 0.044715, %v214_v24  ;;  %v220_v51 = vmul.f32 0.5, %v214_v24 }
  0xc8   :  { %v246_v30 = vadd.f32 1.0, %v1731_v26  ;;  %v2084_v26 = vld [vmem:[#allocation2 + $0x20] sm:$0xff] }
  0xc9   :  { %1732 = vtanh.f32 %v239_v27  ;;  %v228_v32 = vmul.f32 %v224_v28, %v214_v24  ;;  %v299_v28 = vperm.slane %v2084_v26, 0 }
  0xca   :  { %v250_v33 = vmul.f32 %v246_v30, %v218_v29  ;;  %837 = vmatpush.bf16.msra.mxu1 %v1641_v22  ;;  %v304_v30 = vperm.slane %v2084_v26, 2 }
  0xcb   :  { %v232_v34 = vmul.f32 %v228_v32, %v214_v24 }
  0xcc   :  { %v215_v35 = vpop.f32.mrf.mxu0  ;;  %v254_v36 = vmul.f32 %v250_v33, %v134_v31 }
  0xcd   :  { %v216_v37 = vadd.f32 %v215_v35, %v133_v10  ;;  %v236_v38 = vadd.f32 %v232_v34, %v214_v24  ;;  %v1648_v24 = vld [vmem:[%s2215_s2] sm:$0xff] }
  0xce   :  { %258 = vadd.xlane.f32.xlu0 %v254_v36  ;;  %838 = vmatpush.bf16.msra.mxu1 %v1640_v23 }
  0xcf   :  { %v1733_v39 = vpop.eup %1732  ;;  %v225_v40 = vmul.f32 0.044715, %v216_v37  ;;  %v240_v41 = vmul.f32 0.7978846, %v236_v38  ;;  %v221_v56 = vmul.f32 0.5, %v216_v37 }
  0xd0   :  { %v247_v43 = vadd.f32 1.0, %v1733_v39 }
  0xd1   :  { %1734 = vtanh.f32 %v240_v41  ;;  %v229_v44 = vmul.f32 %v225_v40, %v216_v37  ;;  %839 = vmatmul.bf16.vlgmr.msra.gmra.mxu1 %v1648_v24 }
  0xd2   :  { %v251_v45 = vmul.f32 %v247_v43, %v219_v42 }
  0xd3   :  { %v233_v46 = vmul.f32 %v229_v44, %v216_v37 }
  0xd4   :  { %v255_v47 = vmul.f32 %v251_v45, %v134_v31 }
  0xd5   :  { %v237_v48 = vadd.f32 %v233_v46, %v216_v37 }
  0xd6   :  { %260 = vadd.xlane.f32.xlu0 %v255_v47 }
  0xd7   :  { %v1735_v49 = vpop.eup %1734  ;;  %v241_v50 = vmul.f32 0.7978846, %v237_v48 }
  0xd8   :  { %v248_v52 = vadd.f32 1.0, %v1735_v49 }
  0xd9   :  { %1736 = vtanh.f32 %v241_v50 }
  0xda   :  { %v252_v53 = vmul.f32 %v248_v52, %v220_v51 }
  0xdc   :  { %v256_v54 = vmul.f32 %v252_v53, %v134_v31 }
  0xde   :  { %262 = vadd.xlane.f32.xlu1 %v256_v54 }
  0xdf   :  { %v1737_v55 = vpop.eup %1736 }
  0xe0   :  { %v249_v57 = vadd.f32 1.0, %v1737_v55 }
  0xe2   :  { %v253_v58 = vmul.f32 %v249_v57, %v221_v56 }
  0xe4   :  { %v257_v59 = vmul.f32 %v253_v58, %v134_v31  ;;  %v329_v31 = vperm.slane %v2084_v26, 1 }
  0xe6   :  { %264 = vadd.xlane.f32.xlu1 %v257_v59 }
 0x141   :  { %v259_v0 = vpop.xlane.xlu0 %258 }
 0x142   :  { %v267_v1 = vadd.f32 %v2049_v62, %v259_v0 }
 0x144   :  { %v2055_v2 = vsel %vm271_vm0, %v267_v1, -1e+09 }
 0x145   :  { %281 = vperm.xlu2 %1709, %v2055_v2  }
 0x149   :  { %v261_v4 = vpop.xlane.xlu0 %260 }
 0x14a   :  { %v268_v5 = vadd.f32 %v2049_v62, %v261_v4 }
 0x14c   :  { %v2062_v6 = vsel %vm272_vm1, %v268_v5, -1e+09 }
 0x14d   :  { %286 = vperm.xlu2 %1709, %v2062_v6  }
 0x151   :  { %v263_v10 = vpop.xlane.xlu1 %262 }
 0x152   :  { %v269_v11 = vadd.f32 %v2049_v62, %v263_v10  ;;  %v1966_v10 = vmov 2  }
 0x154   :  { %v2069_v12 = vsel %vm273_vm2, %v269_v11, -1e+09 }
 0x155   :  { %291 = vperm.xlu0 %1710, %v2069_v12   ;;  %1712 = vset.pattern.permute.xlu2 %v1964_v14 }
 0x156   :  { %311 = vperm.xlu2 %1712, %v113_v63  }
 0x159   :  { %v265_v17 = vpop.xlane.xlu1 %264 }
 0x15a   :  { %v270_v18 = vadd.f32 %v2049_v62, %v265_v17 }
 0x15c   :  { %v2077_v19 = vsel %vm274_vm3, %v270_v18, -1e+09 }
 0x15d   :  { %296 = vperm.xlu1 %1711, %v2077_v19   ;;  %1720 = vset.pattern.permute.xlu0 %v1964_v14 }
 0x15e   :  { %316 = vperm.xlu2 %1712, %v114_v3  }
 0x166   :  { %321 = vperm.xlu2 %1712, %v115_v7  }
 0x16e   :  { %326 = vperm.xlu2 %1712, %v116_v15  }
 0x19f   :  { %v282_v25 = vpop.permute.xlu2 %281 }
 0x1a0   :  { %v300_v29 = vmul.f32 %v299_v28, %v282_v25 }
 0x1a2   :  { %v305_v33 = vadd.f32 %v304_v30, %v300_v29 }
 0x1a7   :  { %v287_v27 = vpop.permute.xlu2 %286 }
 0x1a8   :  { %v301_v36 = vmul.f32 %v299_v28, %v287_v27 }
 0x1aa   :  { %v306_v40 = vadd.f32 %v304_v30, %v301_v36  ;;  %v840_v36 = vpop.f32.mrf.mxu1 }
 0x1b0   :  { %v312_v32 = vpop.permute.xlu2 %311 }
 0x1b1   :  { %v330_v34 = vmul.f32 %v329_v31, %v312_v32 }
 0x1b3   :  { %v334_v35 = vadd.f32 %v330_v34, %v305_v33 }
 0x1b5   :  { %v342_v37 = vmul.f32 0.044715, %v334_v35  ;;  %v338_v52 = vmul.f32 0.5, %v334_v35 }
 0x1b7   :  { %v346_v38 = vmul.f32 %v342_v37, %v334_v35  ;;  %v773_v37 = vld [vmem:[#allocation2 + $0x2] ss:$0 sm:$0xff] }
 0x1b8   :  { %v317_v39 = vpop.permute.xlu2 %316 }
 0x1b9   :  { %v331_v41 = vmul.f32 %v329_v31, %v317_v39  ;;  %v350_v42 = vmul.f32 %v346_v38, %v334_v35  ;;  %v841_v38 = vadd.f32 %v840_v36, %v773_v37 }
 0x1bb   :  { %v335_v43 = vadd.f32 %v331_v41, %v306_v40  ;;  %v354_v44 = vadd.f32 %v350_v42, %v334_v35  ;;  %v847_v39 = vmul.f32 0.044715, %v841_v38  ;;  %v842_v40 = vpop.f32.mrf.mxu1 }
 0x1bc   :  { %v843_v42 = vadd.f32 %v842_v40, %v773_v37 }
 0x1bd   :  { %v343_v45 = vmul.f32 0.044715, %v335_v43  ;;  %v358_v46 = vmul.f32 0.7978846, %v354_v44  ;;  %v339_v21 = vmul.f32 0.5, %v335_v43  ;;  %v849_v41 = vmul.f32 %v847_v39, %v841_v38 }
 0x1bf   :  { %v347_v47 = vmul.f32 %v343_v45, %v335_v43  ;;  %1738 = vtanh.f32 %v358_v46 }
 0x1c0   :  { %v322_v50 = vpop.permute.xlu2 %321 }
 0x1c1   :  { %v351_v48 = vmul.f32 %v347_v47, %v335_v43  ;;  %v332_v58 = vmul.f32 %v329_v31, %v322_v50 }
 0x1c3   :  { %v355_v51 = vadd.f32 %v351_v48, %v335_v43  ;;  %v848_v43 = vmul.f32 0.044715, %v843_v42 }
 0x1c5   :  { %v1739_v49 = vpop.eup %1738  ;;  %v359_v57 = vmul.f32 0.7978846, %v355_v51  ;;  %v850_v45 = vmul.f32 %v848_v43, %v843_v42  ;;  %v845_v51 = vmul.f32 0.5, %v841_v38 }
 0x1c6   :  { %v366_v53 = vadd.f32 1.0, %v1739_v49 }
 0x1c7   :  { %v292_v54 = vpop.permute.xlu0 %291  ;;  %1740 = vtanh.f32 %v359_v57  ;;  %v852_v47 = vmul.f32 %v850_v45, %v843_v42  ;;  %v846_v57 = vmul.f32 0.5, %v843_v42 }
 0x1c8   :  { %v302_v55 = vmul.f32 %v299_v28, %v292_v54  ;;  %v370_v56 = vmul.f32 %v366_v53, %v338_v52  ;;  %v327_v1 = vpop.permute.xlu2 %326  ;;  %v774_v54 = vld [vmem:[#allocation2 + $0x3] ss:$0 sm:$0xff] }
 0x1c9   :  { %v333_v7 = vmul.f32 %v329_v31, %v327_v1  ;;  %v854_v48 = vadd.f32 %v852_v47, %v843_v42 }
 0x1ca   :  { %v307_v59 = vadd.f32 %v304_v30, %v302_v55  ;;  %405 = vperm.xlu2 %1712, %v370_v56   ;;  %376 = vperm.xlu1 %1711, %v370_v56  }
 0x1cb   :  { %v856_v50 = vmul.f32 0.7978846, %v854_v48 }
 0x1cc   :  { %v336_v63 = vadd.f32 %v332_v58, %v307_v59 }
 0x1cd   :  { %v1741_v13 = vpop.eup %1740 }
 0x1ce   :  { %v344_v0 = vmul.f32 0.044715, %v336_v63  ;;  %v367_v18 = vadd.f32 1.0, %v1741_v13  ;;  %v340_v29 = vmul.f32 0.5, %v336_v63 }
 0x1cf   :  { %v297_v3 = vpop.permute.xlu1 %296 }
 0x1d0   :  { %v303_v4 = vmul.f32 %v299_v28, %v297_v3  ;;  %v348_v5 = vmul.f32 %v344_v0, %v336_v63  ;;  %v371_v23 = vmul.f32 %v367_v18, %v339_v21 }
 0x1d2   :  { %v308_v8 = vadd.f32 %v304_v30, %v303_v4  ;;  %1714 = vset.pattern.permute.xlu2 %v1965_v9  ;;  %1713 = vset.pattern.permute.xlu1 %v1966_v10  ;;  %v352_v11 = vmul.f32 %v348_v5, %v336_v63  ;;  %v2099_v5 = vperm.slane %v2084_v26, 4 }
 0x1d3   :  { %455 = vperm.xlu2 %1714, %v370_v56   ;;  %430 = vperm.xlu1 %1713, %v370_v56  }
 0x1d4   :  { %v337_v15 = vadd.f32 %v333_v7, %v308_v8  ;;  %v356_v16 = vadd.f32 %v352_v11, %v336_v63  ;;  %v399_v7 = vperm.slane %v2084_v26, 7  ;;  %v445_v11 = vperm.slane %v2084_v26, 5 }
 0x1d6   :  { %v345_v17 = vmul.f32 0.044715, %v337_v15  ;;  %v360_v20 = vmul.f32 0.7978846, %v356_v16  ;;  %v341_v33 = vmul.f32 0.5, %v337_v15 }
 0x1d8   :  { %1742 = vtanh.f32 %v360_v20  ;;  %v349_v22 = vmul.f32 %v345_v17, %v337_v15 }
 0x1da   :  { %v353_v24 = vmul.f32 %v349_v22, %v337_v15 }
 0x1db   :  { %1715 = vset.pattern.permute.xlu2 %v1963_v60  ;;  %1716 = vset.pattern.permute.xlu1 %v1964_v14 }
 0x1dc   :  { %381 = vperm.xlu2 %1715, %v371_v23   ;;  %409 = vperm.xlu1 %1716, %v371_v23   ;;  %v357_v25 = vadd.f32 %v353_v24, %v337_v15 }
 0x1de   :  { %v1743_v27 = vpop.eup %1742  ;;  %v361_v28 = vmul.f32 0.7978846, %v357_v25 }
 0x1df   :  { %v368_v30 = vadd.f32 1.0, %v1743_v27 }
 0x1e0   :  { %1744 = vtanh.f32 %v361_v28 }
 0x1e1   :  { %v372_v31 = vmul.f32 %v368_v30, %v340_v29 }
 0x1e3   :  { %413 = vperm.xlu0 %1720, %v372_v31  }
 0x1e4   :  { %1717 = vset.pattern.permute.xlu2 %v1966_v10  ;;  %1718 = vset.pattern.permute.xlu1 %v1965_v9 }
 0x1e5   :  { %434 = vperm.xlu2 %1717, %v371_v23   ;;  %459 = vperm.xlu1 %1718, %v371_v23  }
 0x1e6   :  { %v1745_v32 = vpop.eup %1744 }
 0x1e7   :  { %v369_v34 = vadd.f32 1.0, %v1745_v32 }
 0x1e9   :  { %v373_v35 = vmul.f32 %v369_v34, %v341_v33 }
 0x1eb   :  { %1722 = vset.pattern.permute.xlu0 %v1963_v60 }
 0x1ec   :  { %391 = vperm.xlu0 %1722, %v373_v35  }
 0x1ed   :  { %1723 = vset.pattern.permute.xlu2 %v1964_v14  ;;  %1719 = vset.pattern.permute.xlu1 %v1963_v60  ;;  %v851_v14 = vmul.f32 %v849_v41, %v841_v38 }
 0x1ee   :  { %417 = vperm.xlu2 %1723, %v373_v35   ;;  %386 = vperm.xlu1 %1719, %v372_v31  }
 0x1ef   :  { %v853_v44 = vadd.f32 %v851_v14, %v841_v38  ;;  %v2111_v14 = vperm.slane %v2046_v61, 0 }
 0x1f1   :  { %v855_v46 = vmul.f32 0.7978846, %v853_v44 }
 0x1f3   :  { %1746 = vtanh.f32 %v855_v46 }
 0x1f4   :  { %1725 = vset.pattern.permute.xlu0 %v1966_v10  ;;  %1748 = vtanh.f32 %v856_v50 }
 0x1f5   :  { %442 = vperm.xlu0 %1725, %v373_v35  }
 0x1f6   :  { %1724 = vset.pattern.permute.xlu2 %v1965_v9  ;;  %1721 = vset.pattern.permute.xlu1 %v1966_v10  ;;  %v2104_v10 = vperm.slane %v2084_v26, 6 }
 0x1f7   :  { %463 = vperm.xlu2 %1724, %v372_v31   ;;  %438 = vperm.xlu1 %1721, %v372_v31  }
 0x1f9   :  { %v1747_v49 = vpop.eup %1746 }
 0x1fa   :  { %v859_v52 = vadd.f32 1.0, %v1747_v49  ;;  %v1749_v55 = vpop.eup %1748 }
 0x1fb   :  { %v860_v58 = vadd.f32 1.0, %v1749_v55 }
 0x1fc   :  { %v861_v53 = vmul.f32 %v859_v52, %v845_v51 }
 0x1fd   :  { %1729 = vset.pattern.permute.xlu0 %v1963_v60  ;;  %v862_v59 = vmul.f32 %v860_v58, %v846_v57 }
 0x1fe   :  { %v863_v56 = vmul.f32 %v861_v53, %v774_v54 }
 0x1ff   :  { %1726 = vset.pattern.permute.xlu1 %v1965_v9  ;;  %1727 = vset.pattern.permute.xlu2 %v1963_v60  ;;  %v864_v63 = vmul.f32 %v862_v59, %v774_v54 }
 0x200   :  { %467 = vperm.xlu1 %1726, %v373_v35  }
 0x208   :  { %1728 = vset.pattern.permute.xlu1 %v1963_v60  ;;  %v394_v60 = vperm.slane %v2084_v26, 3 }
 0x220   :  { %865 = vadd.xlane.f32.xlu2 %v863_v56 }
 0x224   :  { %v406_v0 = vpop.permute.xlu2 %405 }
 0x225   :  { %v421_v9 = vmul.f32 %v2099_v5, %v406_v0 }
 0x22a   :  { %867 = vadd.xlane.f32.xlu1 %v864_v63 }
 0x22d   :  { %v456_v4 = vpop.permute.xlu2 %455 }
 0x22e   :  { %v471_v17 = vmul.f32 %v2104_v10, %v456_v4 }
 0x236   :  { %v382_v20 = vpop.permute.xlu2 %381 }
 0x237   :  { %v396_v23 = vmul.f32 %v394_v60, %v382_v20 }
 0x239   :  { %v401_v29 = vadd.f32 %v399_v7, %v396_v23 }
 0x23c   :  { %v377_v1 = vpop.permute.xlu1 %376 }
 0x23d   :  { %v395_v3 = vmul.f32 %v394_v60, %v377_v1 }
 0x23f   :  { %v400_v8 = vadd.f32 %v399_v7, %v395_v3  ;;  %v435_v31 = vpop.permute.xlu2 %434 }
 0x240   :  { %v447_v33 = vmul.f32 %v445_v11, %v435_v31 }
 0x241   :  { %v425_v15 = vadd.f32 %v421_v9, %v400_v8 }
 0x245   :  { %v431_v13 = vpop.permute.xlu1 %430 }
 0x246   :  { %v446_v16 = vmul.f32 %v445_v11, %v431_v13 }
 0x248   :  { %v450_v18 = vadd.f32 %v446_v16, %v425_v15  ;;  %v418_v44 = vpop.permute.xlu2 %417 }
 0x249   :  { %v424_v15 = vmul.f32 %v2099_v5, %v418_v44  ;;  %v2148_v44 = vperm.slane %v2046_v61, 1 }
 0x24a   :  { %v475_v21 = vadd.f32 %v471_v17, %v450_v18 }
 0x24c   :  { %v483_v22 = vmul.f32 0.044715, %v475_v21  ;;  %v479_v41 = vmul.f32 0.5, %v475_v21 }
 0x24e   :  { %v487_v24 = vmul.f32 %v483_v22, %v475_v21  ;;  %v410_v25 = vpop.permute.xlu1 %409 }
 0x24f   :  { %v422_v27 = vmul.f32 %v2099_v5, %v410_v25 }
 0x250   :  { %v491_v28 = vmul.f32 %v487_v24, %v475_v21 }
 0x251   :  { %v426_v32 = vadd.f32 %v422_v27, %v401_v29  ;;  %v464_v55 = vpop.permute.xlu2 %463 }
 0x252   :  { %v495_v30 = vadd.f32 %v491_v28, %v475_v21  ;;  %v473_v0 = vmul.f32 %v2104_v10, %v464_v55 }
 0x253   :  { %v451_v36 = vadd.f32 %v447_v33, %v426_v32 }
 0x254   :  { %v499_v26 = vmul.f32 0.7978846, %v495_v30 }
 0x255   :  { %v414_v35 = vpop.permute.xlu0 %413 }
 0x256   :  { %1750 = vtanh.f32 %v499_v26  ;;  %v423_v54 = vmul.f32 %v2099_v5, %v414_v35 }
 0x257   :  { %v460_v34 = vpop.permute.xlu1 %459 }
 0x258   :  { %v472_v37 = vmul.f32 %v2104_v10, %v460_v34 }
 0x25a   :  { %v476_v38 = vadd.f32 %v472_v37, %v451_v36 }
 0x25c   :  { %v1751_v39 = vpop.eup %1750  ;;  %v484_v40 = vmul.f32 0.044715, %v476_v38  ;;  %v480_v8 = vmul.f32 0.5, %v476_v38 }
 0x25d   :  { %v507_v42 = vadd.f32 1.0, %v1751_v39 }
 0x25e   :  { %v488_v43 = vmul.f32 %v484_v40, %v476_v38  ;;  %v392_v49 = vpop.permute.xlu0 %391 }
 0x25f   :  { %v511_v45 = vmul.f32 %v507_v42, %v479_v41  ;;  %v398_v56 = vmul.f32 %v394_v60, %v392_v49 }
 0x260   :  { %v492_v46 = vmul.f32 %v488_v43, %v476_v38  ;;  %v387_v47 = vpop.permute.xlu1 %386 }
 0x261   :  { %v2114_v48 = vmul.f32 %v2111_v14, %v511_v45  ;;  %v397_v50 = vmul.f32 %v394_v60, %v387_v47  ;;  %v403_v4 = vadd.f32 %v399_v7, %v398_v56 }
 0x262   :  { %v496_v51 = vadd.f32 %v492_v46, %v476_v38 }
 0x263   :  { %529 = vrot.lane.b32.xlu0 %v2114_v48, %s1967_s26  ;;  %v402_v53 = vadd.f32 %v399_v7, %v397_v50  ;;  %v428_v18 = vadd.f32 %v424_v15, %v403_v4  ;;  %v521_v46 = vadd.f32 %v2148_v44, %v2114_v48 }
 0x264   :  { %v500_v52 = vmul.f32 0.7978846, %v496_v51 }
 0x265   :  { %v427_v58 = vadd.f32 %v423_v54, %v402_v53 }
 0x266   :  { %1752 = vtanh.f32 %v500_v52 }
 0x267   :  { %v443_v1 = vpop.permute.xlu0 %442 }
 0x268   :  { %v449_v16 = vmul.f32 %v445_v11, %v443_v1 }
 0x269   :  { %v439_v57 = vpop.permute.xlu1 %438 }
 0x26a   :  { %v448_v59 = vmul.f32 %v445_v11, %v439_v57  ;;  %v453_v23 = vadd.f32 %v449_v16, %v428_v18 }
 0x26b   :  { %545 = vrot.lane.b32.xlu0 %v2114_v48, %s1968_s7 }
 0x26c   :  { %v1753_v63 = vpop.eup %1752  ;;  %v452_v3 = vadd.f32 %v448_v59, %v427_v58 }
 0x26d   :  { %v508_v9 = vadd.f32 1.0, %v1753_v63 }
 0x26e   :  { %v477_v13 = vadd.f32 %v473_v0, %v452_v3 }
 0x26f   :  { %v512_v60 = vmul.f32 %v508_v9, %v480_v8 }
 0x270   :  { %v485_v17 = vmul.f32 0.044715, %v477_v13  ;;  %v481_v32 = vmul.f32 0.5, %v477_v13 }
 0x271   :  { %v517_v20 = vmul.f32 %v2111_v14, %v512_v60 }
 0x272   :  { %v489_v21 = vmul.f32 %v485_v17, %v477_v13  ;;  %v468_v22 = vpop.permute.xlu1 %467 }
 0x273   :  { %v474_v24 = vmul.f32 %v2104_v10, %v468_v22  ;;  %561 = vrot.lane.b32.xlu0 %v2114_v48, %s1969_s27  ;;  %531 = vrot.lane.b32.xlu2 %v517_v20, %s1967_s26  ;;  %v522_v54 = vadd.f32 %v2148_v44, %v517_v20 }
 0x274   :  { %v493_v7 = vmul.f32 %v489_v21, %v477_v13 }
 0x275   :  { %v478_v25 = vadd.f32 %v474_v24, %v453_v23 }
 0x276   :  { %v497_v5 = vadd.f32 %v493_v7, %v477_v13 }
 0x277   :  { %v486_v11 = vmul.f32 0.044715, %v478_v25  ;;  %v482_v36 = vmul.f32 0.5, %v478_v25 }
 0x278   :  { %v501_v27 = vmul.f32 0.7978846, %v497_v5 }
 0x279   :  { %v490_v28 = vmul.f32 %v486_v11, %v478_v25 }
 0x27a   :  { %1754 = vtanh.f32 %v501_v27 }
 0x27b   :  { %v494_v29 = vmul.f32 %v490_v28, %v478_v25  ;;  %547 = vrot.lane.b32.xlu0 %v517_v20, %s1968_s7  ;;  %563 = vrot.lane.b32.xlu2 %v517_v20, %s1969_s27 }
 0x27d   :  { %v498_v30 = vadd.f32 %v494_v29, %v478_v25 }
 0x27f   :  { %v502_v10 = vmul.f32 0.7978846, %v498_v30 }
 0x280   :  { %v1755_v31 = vpop.eup %1754 }
 0x281   :  { %v509_v26 = vadd.f32 1.0, %v1755_v31  ;;  %1756 = vtanh.f32 %v502_v10 }
 0x283   :  { %v513_v33 = vmul.f32 %v509_v26, %v481_v32 }
 0x285   :  { %v518_v34 = vmul.f32 %v2111_v14, %v513_v33 }
 0x287   :  { %v1757_v35 = vpop.eup %1756  ;;  %549 = vrot.lane.b32.xlu0 %v518_v34, %s1968_s7  ;;  %533 = vrot.lane.b32.xlu1 %v518_v34, %s1967_s26  ;;  %v523_v8 = vadd.f32 %v2148_v44, %v518_v34 }
 0x288   :  { %v510_v37 = vadd.f32 1.0, %v1757_v35 }
 0x28a   :  { %v514_v38 = vmul.f32 %v510_v37, %v482_v36 }
 0x28c   :  { %v2134_v39 = vmul.f32 %v2111_v14, %v514_v38 }
 0x28e   :  { %v524_v35 = vadd.f32 %v2148_v44, %v2134_v39 }
 0x28f   :  { %565 = vrot.lane.b32.xlu1 %v518_v34, %s1969_s27  ;;  %535 = vrot.lane.b32.xlu0 %v2134_v39, %s1967_s26 }
 0x293   :  { %v866_v40 = vpop.xlane.xlu2 %865 }
 0x294   :  { %v869_v41 = vadd.f32 %v866_v40, %v2049_v62 }
 0x297   :  { %551 = vrot.lane.b32.xlu0 %v2134_v39, %s1968_s7 }
 0x29d   :  { %v868_v42 = vpop.xlane.xlu1 %867 }
 0x29e   :  { %v870_v14 = vadd.f32 %v868_v42, %v2049_v62 }
 0x29f   :  { %567 = vrot.lane.b32.xlu0 %v2134_v39, %s1969_s27 }
 0x2a7   :  { %875 = vrot.lane.b32.xlu0 %v869_v41, %s1967_s26 }
 0x2af   :  { %877 = vrot.lane.b32.xlu0 %v870_v14, %s1967_s26 }
 0x2cd   :  { %v532_v50 = vpop.permute.xlu2 %531 }
 0x2ce   :  { %v542_v62 = vadd.f32 %v532_v50, %v522_v54 }
 0x2d5   :  { %v530_v43 = vpop.permute.xlu0 %529  ;;  %v564_v57 = vpop.permute.xlu2 %563 }
 0x2d6   :  { %v541_v47 = vadd.f32 %v530_v43, %v521_v46 }
 0x2dd   :  { %v546_v45 = vpop.permute.xlu0 %545 }
 0x2de   :  { %v557_v49 = vadd.f32 %v546_v45, %v541_v47 }
 0x2e5   :  { %v562_v51 = vpop.permute.xlu0 %561 }
 0x2e6   :  { %v573_v52 = vadd.f32 %v562_v51, %v557_v49 }
 0x2e8   :  { %v1430_v53 = vmul.f32 -1.442695, %v573_v52 }
 0x2ea   :  { %1758 = vpow2.f32 %v1430_v53 }
 0x2ed   :  { %v548_v55 = vpop.permute.xlu0 %547 }
 0x2ee   :  { %v558_v56 = vadd.f32 %v548_v55, %v542_v62 }
 0x2f0   :  { %v1759_v58 = vpop.eup %1758  ;;  %v574_v61 = vadd.f32 %v564_v57, %v558_v56 }
 0x2f1   :  { %v589_v59 = vadd.f32 1.0, %v1759_v58 }
 0x2f2   :  { %v1431_v63 = vmul.f32 -1.442695, %v574_v61  ;;  %v755_v61 = vld [vmem:[%s2216_s3 + $0x8] sm:$0xff] }
 0x2f3   :  { %1760 = vrcp.f32 %v589_v59  ;;  %v604_v23 = vand.u32 2147483648, %v589_v59  ;;  %vm598_vm5 = vweird.f32 %v589_v59  ;;  %v602_v24 = vand.u32 2147483647, %v589_v59 }
 0x2f4   :  { %1762 = vpow2.f32 %v1431_v63  ;;  %vm872_vm14 = vcmp.gt.f32.partialorder %v755_v61, 0.5 }
 0x2f5   :  { %v605_v27 = vor.u32 1.1754944e-38, %v604_v23  ;;  %vm603_vm7 = vcmp.eq.f32.partialorder %v602_v24, 8.507059e+37 }
 0x2f9   :  { %v1761_v48 = vpop.eup %1760  ;;  %v550_v0 = vpop.permute.xlu0 %549 }
 0x2fa   :  { %v534_v1 = vpop.permute.xlu1 %533  ;;  %v1763_v3 = vpop.eup %1762  ;;  %v594_v4 = vmul.f32 %v1761_v48, %v589_v59  ;;  %vm599_vm4 = vweird.f32 %v1761_v48 }
 0x2fb   :  { %v590_v9 = vadd.f32 1.0, %v1763_v3  ;;  %v543_v15 = vadd.f32 %v534_v1, %v523_v8  ;;  %vm600_vm6 = vmor %vm598_vm5, %vm599_vm4 }
 0x2fc   :  { %v595_v13 = vsub.f32 1.0, %v594_v4 }
 0x2fd   :  { %1764 = vrcp.f32 %v590_v9  ;;  %v559_v60 = vadd.f32 %v550_v0, %v543_v15  ;;  %v619_v28 = vand.u32 2147483648, %v590_v9  ;;  %v617_v30 = vand.u32 2147483647, %v590_v9 }
 0x2fe   :  { %v596_v16 = vmul.f32 %v1761_v48, %v595_v13  ;;  %vm613_vm9 = vweird.f32 %v590_v9 }
 0x2ff   :  { %v620_v26 = vor.u32 1.1754944e-38, %v619_v28  ;;  %vm618_vm11 = vcmp.eq.f32.partialorder %v617_v30, 8.507059e+37 }
 0x300   :  { %v597_v20 = vadd.f32 %v1761_v48, %v596_v16 }
 0x301   :  { %v536_v17 = vpop.permute.xlu0 %535 }
 0x302   :  { %v566_v18 = vpop.permute.xlu1 %565  ;;  %v601_v11 = vsel %vm600_vm6, %v1761_v48, %v597_v20  ;;  %v544_v40 = vadd.f32 %v536_v17, %v524_v35 }
 0x303   :  { %v575_v21 = vadd.f32 %v566_v18, %v559_v60  ;;  %v1765_v22 = vpop.eup %1764  ;;  %v606_v31 = vsel %vm603_vm7, %v605_v27, %v601_v11  ;;  %vm949_vm7 = vcmask 1041409  }
 0x304   :  { %v609_v7 = vmul.f32 %v1765_v22, %v590_v9  ;;  %vm614_vm8 = vweird.f32 %v1765_v22  ;;  %v653_v36 = vmul.f32 %v606_v31, %v2055_v2  ;;  %v754_v2 = vld [vmem:[%s2216_s3] sm:$0xff] }
 0x305   :  { %v1432_v25 = vmul.f32 -1.442695, %v575_v21  ;;  %vm615_vm10 = vmor %vm613_vm9, %vm614_vm8  ;;  %vm871_vm13 = vcmp.gt.f32.partialorder %v754_v2, 0.5  ;;  %vm1113_vm8 = vcmask 1041408  }
 0x306   :  { %v610_v5 = vsub.f32 1.0, %v609_v7  ;;  %v658_v14 = vsel %vm657_vm12, %v653_v36, -inf }
 0x307   :  { %1766 = vpow2.f32 %v1432_v25 }
 0x308   :  { %v611_v29 = vmul.f32 %v1765_v22, %v610_v5 }
 0x309   :  { %v552_v10 = vpop.permute.xlu0 %551 }
 0x30a   :  { %v612_v32 = vadd.f32 %v1765_v22, %v611_v29  ;;  %v560_v42 = vadd.f32 %v552_v10, %v544_v40 }
 0x30c   :  { %v616_v34 = vsel %vm615_vm10, %v1765_v22, %v612_v32 }
 0x30d   :  { %v1767_v33 = vpop.eup %1766  ;;  %v621_v38 = vsel %vm618_vm11, %v620_v26, %v616_v34 }
 0x30e   :  { %v2157_v37 = vadd.f32 1.0, %v1767_v33  ;;  %v654_v41 = vmul.f32 %v621_v38, %v2062_v6 }
 0x310   :  { %1768 = vrcp.f32 %v2157_v37  ;;  %v659_v43 = vsel %vm657_vm12, %v654_v41, -inf  ;;  %v632_v22 = vand.u32 2147483647, %v2157_v37  ;;  %v634_v23 = vand.u32 2147483648, %v2157_v37 }
 0x311   :  { %v568_v45 = vpop.permute.xlu0 %567  ;;  %v660_v46 = vmax.f32 %v658_v14, %v659_v43  ;;  %vm628_vm0 = vweird.f32 %v2157_v37 }
 0x312   :  { %v576_v47 = vadd.f32 %v568_v45, %v560_v42  ;;  %vm633_vm2 = vcmp.eq.f32.partialorder %v632_v22, 8.507059e+37  ;;  %v635_v30 = vor.u32 1.1754944e-38, %v634_v23 }
 0x313   :  { %v661_v39 = vrot.slane %v660_v46, 4 }
 0x314   :  { %v1433_v44 = vmul.f32 -1.442695, %v576_v47 }
 0x315   :  { %v662_v50 = vmax.f32 %v660_v46, %v661_v39 }
 0x316   :  { %v1769_v49 = vpop.eup %1768  ;;  %1770 = vpow2.f32 %v1433_v44 }
 0x317   :  { %v663_v6 = vrot.slane %v662_v50, 2  ;;  %v624_v51 = vmul.f32 %v1769_v49, %v2157_v37  ;;  %vm629_vm15 = vweird.f32 %v1769_v49 }
 0x318   :  { %vm2179_vm1 = vmor %vm628_vm0, %vm629_vm15 }
 0x319   :  { %v876_v52 = vpop.permute.xlu0 %875  ;;  %v664_v53 = vmax.f32 %v662_v50, %v663_v6  ;;  %v625_v57 = vsub.f32 1.0, %v624_v51 }
 0x31a   :  { %v881_v54 = vsel %vm871_vm13, %v876_v52, -1e+09 }
 0x31b   :  { %v883_v62 = vsel %vm657_vm12, %v881_v54, -inf  ;;  %v665_v55 = vrot.slane %v664_v53, 1  ;;  %v626_v0 = vmul.f32 %v1769_v49, %v625_v57 }
 0x31c   :  { %v1771_v56 = vpop.eup %1770  ;;  %v884_v58 = vrot.slane %v883_v62, 4 }
 0x31d   :  { %v592_v59 = vadd.f32 1.0, %v1771_v56  ;;  %v666_v63 = vmax.f32 %v664_v53, %v665_v55  ;;  %v627_v17 = vadd.f32 %v1769_v49, %v626_v0 }
 0x31e   :  { %v885_v48 = vmax.f32 %v883_v62, %v884_v58 }
 0x31f   :  { %1772 = vrcp.f32 %v592_v59  ;;  %v676_v3 = vsub.f32 %v653_v36, %v666_v63  ;;  %v677_v4 = vsub.f32 %v654_v41, %v666_v63  ;;  %v631_v11 = vsel %vm2179_vm1, %v1769_v49, %v627_v17 }
 0x320   :  { %v886_v1 = vrot.slane %v885_v48, 2  ;;  %v647_v10 = vand.u32 2147483647, %v592_v59  ;;  %v649_v31 = vand.u32 2147483648, %v592_v59  ;;  %v636_v36 = vsel %vm633_vm2, %v635_v30, %v631_v11 }
 0x321   :  { %v878_v8 = vpop.permute.xlu0 %877  ;;  %v680_v15 = vmul.f32 1.442695, %v676_v3  ;;  %v682_v60 = vmul.f32 1.442695, %v677_v4  ;;  %vm643_vm4 = vweird.f32 %v592_v59  ;;  %v655_v45 = vmul.f32 %v636_v36, %v2069_v12 }
 0x322   :  { %v887_v9 = vmax.f32 %v885_v48, %v886_v1  ;;  %v2171_v13 = vsel %vm872_vm14, %v878_v8, -1e+09  ;;  %v650_v41 = vor.u32 1.1754944e-38, %v649_v31  ;;  %vm648_vm6 = vcmp.eq.f32.partialorder %v647_v10, 8.507059e+37 }
 0x323   :  { %v890_v16 = vsel %vm657_vm12, %v2171_v13, -inf  ;;  %1774 = vpow2.f32 %v680_v15  ;;  %v667_v50 = vsel %vm657_vm12, %v655_v45, -inf }
 0x324   :  { %v888_v18 = vrot.slane %v887_v9, 1  ;;  %v891_v20 = vrot.slane %v890_v16, 4  ;;  %1776 = vpow2.f32 %v682_v60 }
 0x325   :  { %v1773_v21 = vpop.eup %1772 }
 0x326   :  { %v639_v24 = vmul.f32 %v1773_v21, %v592_v59  ;;  %v889_v7 = vmax.f32 %v887_v9, %v888_v18  ;;  %v892_v25 = vmax.f32 %v890_v16, %v891_v20  ;;  %vm644_vm3 = vweird.f32 %v1773_v21 }
 0x327   :  { %vm645_vm5 = vmor %vm643_vm4, %vm644_vm3 }
 0x328   :  { %v640_v27 = vsub.f32 1.0, %v639_v24  ;;  %v897_v28 = vsub.f32 %v881_v54, %v889_v7  ;;  %v893_v29 = vrot.slane %v892_v25, 2 }
 0x329   :  { %v1775_v32 = vpop.eup %1774 }
 0x32a   :  { %v641_v26 = vmul.f32 %v1773_v21, %v640_v27  ;;  %v899_v33 = vmul.f32 1.442695, %v897_v28  ;;  %v894_v34 = vmax.f32 %v892_v25, %v893_v29  ;;  %v1777_v35 = vpop.eup %1776  ;;  %v688_v37 = vsel %vm657_vm12, %v1775_v32, 0.0 }
 0x32b   :  { %v689_v40 = vsel %vm657_vm12, %v1777_v35, 0.0 }
 0x32c   :  { %v642_v38 = vadd.f32 %v1773_v21, %v641_v26  ;;  %1778 = vpow2.f32 %v899_v33  ;;  %v690_v42 = vadd.f32 %v689_v40, %v688_v37  ;;  %v895_v14 = vrot.slane %v894_v34, 1 }
 0x32e   :  { %v646_v43 = vsel %vm645_vm5, %v1773_v21, %v642_v38  ;;  %v691_v46 = vrot.slane %v690_v42, 4  ;;  %v896_v49 = vmax.f32 %v894_v34, %v895_v14  ;;  %v1664_v14 = vld [vmem:[#allocation7 + $0x78] sm:$0xff] }
 0x32f   :  { %v651_v47 = vsel %vm648_vm6, %v650_v41, %v646_v43  ;;  %1100 = vmatpush.bf16.msra.mxu3 %v1664_v14  ;;  %v1663_v43 = vld [vmem:[#allocation7 + $0x70] sm:$0xff] }
 0x330   :  { %v656_v39 = vmul.f32 %v651_v47, %v2077_v19  ;;  %v692_v44 = vadd.f32 %v691_v46, %v690_v42  ;;  %v898_v12 = vsub.f32 %v2171_v13, %v896_v49  ;;  %v1661_v46 = vld [vmem:[#allocation7 + $0x60] sm:$0xff]  ;;  %v1660_v47 = vld [vmem:[#allocation7 + $0x58] sm:$0xff]  ;;  %v1658_v49 = vld [vmem:[#allocation7 + $0x48] sm:$0xff] }
 0x332   :  { %v1779_v2 = vpop.eup %1778  ;;  %v668_v6 = vsel %vm657_vm12, %v656_v39, -inf  ;;  %v693_v52 = vrot.slane %v692_v44, 2  ;;  %v901_v48 = vmul.f32 1.442695, %v898_v12 }
 0x333   :  { %v903_v51 = vsel %vm657_vm12, %v1779_v2, 0.0  ;;  %v669_v53 = vmax.f32 %v667_v50, %v668_v6  ;;  %1101 = vmatpush.bf16.msra.mxu3 %v1663_v43  ;;  %v1654_v50 = vld [vmem:[#allocation7 + $0x28] sm:$0xff]  ;;  %v1657_v6 = vld [vmem:[#allocation7 + $0x40] sm:$0xff] }
 0x334   :  { %v904_v54 = vrot.slane %v903_v51, 4  ;;  %v694_v62 = vadd.f32 %v693_v52, %v692_v44  ;;  %v1659_v44 = vld [vmem:[#allocation7 + $0x50] sm:$0xff] }
 0x335   :  { %v670_v55 = vrot.slane %v669_v53, 4 }
 0x336   :  { %v905_v56 = vadd.f32 %v904_v54, %v903_v51  ;;  %v695_v57 = vrot.slane %v694_v62, 1  ;;  %v775_v54 = vld [vmem:[%s2215_s2] sm:$0xff]  }
 0x337   :  { %v671_v58 = vmax.f32 %v669_v53, %v670_v55  ;;  %v1653_v53 = vld [vmem:[#allocation7 + $0x20] sm:$0xff]  ;;  %v1652_v55 = vld [vmem:[#allocation7 + $0x18] sm:$0xff] }
 0x338   :  { %v906_v19 = vrot.slane %v905_v56, 2  ;;  %v696_v61 = vadd.f32 %v695_v57, %v694_v62  ;;  %v921_v62 = vunpack.c.l.bf16 %v775_v54 }
 0x339   :  { %v672_v59 = vrot.slane %v671_v58, 2 }
 0x33a   :  { %v907_v63 = vadd.f32 %v906_v19, %v905_v56  ;;  %1780 = vrcp.f32 %v696_v61  ;;  %v1650_v61 = vld [vmem:[#allocation7 + $0x8] sm:$0xff] }
 0x33b   :  { %v673_v0 = vmax.f32 %v671_v58, %v672_v59  ;;  %1782 = vpow2.f32 %v901_v48  ;;  %v1651_v58 = vld [vmem:[#allocation7 + $0x10] sm:$0xff]  ;;  %v135_v48 = vld [vmem:[%s2213_s0] sm:$0xff]  }
 0x33c   :  { %v908_v1 = vrot.slane %v907_v63, 1 }
 0x33d   :  { %v674_v3 = vrot.slane %v673_v0, 1 }
 0x33e   :  { %v909_v4 = vadd.f32 %v908_v1, %v907_v63  ;;  %v922_v63 = vunpack.c.h.bf16 %v775_v54  ;;  %v713_v1 = vunpack.c.h.bf16 %v135_v48 }
 0x33f   :  { %v675_v8 = vmax.f32 %v673_v0, %v674_v3  ;;  %v1649_v0 = vld [vmem:[#allocation7] sm:$0xff] }
 0x340   :  { %1784 = vrcp.f32 %v909_v4  ;;  %v1781_v9 = vpop.eup %1780  ;;  %v712_v4 = vunpack.c.l.bf16 %v135_v48  ;;  %v1670_v48 = vld [vmem:[#allocation8 + $0x28] sm:$0xff] }
 0x341   :  { %v678_v15 = vsub.f32 %v655_v45, %v675_v8  ;;  %v679_v16 = vsub.f32 %v656_v39, %v675_v8  ;;  %v708_v60 = vmul.f32 %v1781_v9, %v1775_v32  ;;  %v709_v13 = vmul.f32 %v1781_v9, %v1777_v35  ;;  %v1783_v20 = vpop.eup %1782  ;;  %v1662_v45 = vld [vmem:[#allocation7 + $0x68] sm:$0xff]  ;;  %v1656_v39 = vld [vmem:[#allocation7 + $0x38] sm:$0xff] }
 0x342   :  { %v910_v22 = vsel %vm657_vm12, %v1783_v20, 0.0  ;;  %1102 = vmatpush.bf16.msra.mxu3 %v1662_v45  ;;  %1087 = vmatpush.bf16.msra.mxu2 %v1656_v39  ;;  %v990_v39 = vld [vmem:[#allocation2 + $0x4] ss:$0 sm:$0xff] }
 0x343   :  { %v684_v17 = vmul.f32 1.442695, %v678_v15  ;;  %v686_v18 = vmul.f32 1.442695, %v679_v16  ;;  %718 = vperm.xlu2 %1727, %v708_v60   ;;  %723 = vperm.xlu1 %1728, %v709_v13   ;;  %v911_v24 = vrot.slane %v910_v22, 4 }
 0x345   :  { %1786 = vpow2.f32 %v684_v17  ;;  %v912_v27 = vadd.f32 %v911_v24, %v910_v22 }
 0x346   :  { %v1785_v21 = vpop.eup %1784  ;;  %1788 = vpow2.f32 %v686_v18  ;;  %1103 = vmatpush.bf16.msra.mxu3 %v1661_v46 }
 0x347   :  { %v919_v23 = vmul.f32 %v1785_v21, %v1779_v2  ;;  %v913_v30 = vrot.slane %v912_v27, 2  ;;  %v1655_v2 = vld [vmem:[#allocation7 + $0x30] sm:$0xff] }
 0x348   :  { %1088 = vmatpush.bf16.msra.mxu2 %v1655_v2 }
 0x349   :  { %v914_v32 = vadd.f32 %v913_v30, %v912_v27 }
 0x34a   :  { %1104 = vmatpush.bf16.msra.mxu3 %v1660_v47 }
 0x34b   :  { %v1787_v7 = vpop.eup %1786  ;;  %925 = vperm.xlu1 %1728, %v919_v23   ;;  %v915_v35 = vrot.slane %v914_v32, 1  ;;  %v138_v23 = vld [vmem:[%s2213_s0 + $0x8] sm:$0xff]   ;;  %s1971_s0 = smov [#allocation11]  }
 0x34c   :  { %v1789_v25 = vpop.eup %1788  ;;  %v697_v5 = vsel %vm657_vm12, %v1787_v7, 0.0  ;;  %1089 = vmatpush.bf16.msra.mxu2 %v1654_v50  ;;  %s1376_s14 = sshll.u32 %s1971_s0, 4  ;;  %s1377_s14 = int_to_ptr.vmem [resolvable:$true] %s1376_s14 }
 0x34d   :  { %v698_v11 = vsel %vm657_vm12, %v1789_v25, 0.0  ;;  %v916_v36 = vadd.f32 %v915_v35, %v914_v32 }
 0x34e   :  { %v699_v28 = vadd.f32 %v698_v11, %v697_v5  ;;  %1105 = vmatpush.bf16.msra.mxu3 %v1659_v44  ;;  %v714_v5 = vunpack.c.l.bf16 %v138_v23 }
 0x350   :  { %v700_v29 = vrot.slane %v699_v28, 4  ;;  %1090 = vmatpush.bf16.msra.mxu2 %v1653_v53 }
 0x352   :  { %v701_v10 = vadd.f32 %v700_v29, %v699_v28  ;;  %1106 = vmatpush.bf16.msra.mxu3 %v1658_v49 }
 0x354   :  { %v702_v31 = vrot.slane %v701_v10, 2  ;;  %1091 = vmatpush.bf16.msra.mxu2 %v1652_v55 }
 0x356   :  { %v703_v26 = vadd.f32 %v702_v31, %v701_v10  ;;  %1107 = vmatpush.bf16.msra.mxu3 %v1657_v6 }
 0x358   :  { %v704_v33 = vrot.slane %v703_v26, 1  ;;  %1092 = vmatpush.bf16.msra.mxu2 %v1651_v58 }
 0x35a   :  { %v705_v34 = vadd.f32 %v704_v33, %v703_v26 }
 0x35c   :  { %1790 = vrcp.f32 %v705_v34  ;;  %1093 = vmatpush.bf16.msra.mxu2 %v1650_v61 }
 0x35d   :  { %1792 = vrcp.f32 %v916_v36 }
 0x360   :  { %1094 = vmatpush.bf16.msra.mxu2 %v1649_v0  ;;  %v1669_v0 = vld [vmem:[#allocation8 + $0x20] sm:$0xff] }
 0x362   :  { %v1791_v37 = vpop.eup %1790 }
 0x363   :  { %v711_v38 = vmul.f32 %v1791_v37, %v1789_v25  ;;  %v710_v40 = vmul.f32 %v1791_v37, %v1787_v7  ;;  %v1793_v41 = vpop.eup %1792  ;;  %v715_v25 = vunpack.c.h.bf16 %v138_v23  ;;  %v1685_v23 = vld [vmem:[#allocation10 + $0x64] sm:$0xf] }
 0x364   :  { %v920_v42 = vmul.f32 %v1793_v41, %v1783_v20 }
 0x365   :  { %733 = vperm.xlu2 %1727, %v711_v38   ;;  %728 = vperm.xlu0 %1729, %v710_v40  }
 0x36d   :  { %930 = vperm.xlu2 %1727, %v920_v42  }
 0x39d   :  { %v719_v52 = vpop.permute.xlu2 %718 }
 0x39e   :  { %v736_v60 = vmul.f32 %v719_v52, %v712_v4  ;;  %v1672_v52 = vld [vmem:[#allocation8 + $0x38] sm:$0xff]  ;;  %v1666_v4 = vld [vmem:[#allocation8 + $0x8] sm:$0xff] }
 0x39f   :  { %1213 = vmatpush.bf16.msrb.mxu0 %v1672_v52  ;;  %v1584_v52 = vld [vmem:[#allocation10 + $0x20] sm:$0xf] }
 0x3b5   :  { %v724_v51 = vpop.permute.xlu1 %723 }
 0x3b6   :  { %v737_v15 = vmul.f32 %v724_v51, %v713_v1  ;;  %v1970_v51 = vmov 128.0   ;;  %v1668_v1 = vld [vmem:[#allocation8 + $0x18] sm:$0xff] }
 0x3b7   :  { %1794 = vrcp.f32 %v1970_v51  ;;  %v1594_v51 = vld [vmem:[#allocation10 + $0x38] sm:$0xf0] }
 0x3b8   :  { %v740_v18 = vadd.f32 %v737_v15, %v736_v60  ;;  %v1688_v15 = vld [vmem:[#allocation10 + $0x74] sm:$0xf0] }
 0x3ba   :  { %v741_v24 = vrot.slane %v740_v18, 4 }
 0x3bc   :  { %v742_v28 = vadd.f32 %v741_v24, %v740_v18  ;;  %v1616_v18 = vld [vmem:[#allocation10 + $0x60] sm:$0xf]  ;;  %v1618_v24 = vld [vmem:[#allocation10 + $0x68] sm:$0xf0] }
 0x3bd   :  { %v926_v56 = vpop.permute.xlu1 %925  ;;  %v1795_v53 = vpop.eup %1794 }
 0x3be   :  { %v933_v12 = vmul.f32 %v926_v56, %v921_v62  ;;  %v743_v26 = vrot.slane %v742_v28, 2  ;;  %v1118_v54 = vmul.f32 128.0, %v1795_v53  ;;  %vm1122_vm9 = vweird.f32 %v1795_v53 }
 0x3bf   :  { %v734_v57 = vpop.permute.xlu2 %733 }
 0x3c0   :  { %v935_v19 = vrot.slane %v933_v12, 4  ;;  %v739_v31 = vmul.f32 %v734_v57, %v715_v25  ;;  %v744_v35 = vadd.f32 %v743_v26, %v742_v28  ;;  %v1119_v62 = vsub.f32 1.0, %v1118_v54 }
 0x3c2   :  { %v936_v59 = vadd.f32 %v935_v19, %v933_v12  ;;  %v745_v40 = vrot.slane %v744_v35, 1  ;;  %v1120_v55 = vmul.f32 %v1795_v53, %v1119_v62  ;;  %v1677_v62 = vld [vmem:[#allocation10 + $0x24] sm:$0xf] }
 0x3c4   :  { %v937_v8 = vrot.slane %v936_v59, 2  ;;  %v746_v42 = vadd.f32 %v745_v40, %v744_v35  ;;  %v1121_v56 = vadd.f32 %v1795_v53, %v1120_v55  ;;  %v1683_v40 = vld [vmem:[#allocation10 + $0x54] sm:$0xf]  ;;  %v1586_v55 = vld [vmem:[#allocation10 + $0x28] sm:$0xf0] }
 0x3c6   :  { %v938_v13 = vadd.f32 %v937_v8, %v936_v59  ;;  %v1123_v12 = vsel %vm1122_vm9, %v1795_v53, %v1121_v56  ;;  %v1665_v8 = vld [vmem:[#allocation8] sm:$0xff]  ;;  %v1678_v53 = vld [vmem:[#allocation10 + $0x24] sm:$0xf0] }
 0x3c7   :  { %v931_v3 = vpop.permute.xlu2 %930  ;;  %v1585_v56 = vor.u32 %v1678_v53, %v1584_v52 }
 0x3c8   :  { %v934_v9 = vmul.f32 %v931_v3, %v922_v63  ;;  %v939_v21 = vrot.slane %v938_v13, 1  ;;  %v1671_v63 = vld [vmem:[#allocation8 + $0x30] sm:$0xff] }
 0x3c9   :  { %1214 = vmatpush.bf16.msrb.mxu0 %v1671_v63  ;;  %v1667_v3 = vld [vmem:[#allocation8 + $0x10] sm:$0xff] }
 0x3ca   :  { %v941_v16 = vrot.slane %v934_v9, 4  ;;  %v940_v11 = vadd.f32 %v939_v21, %v938_v13 }
 0x3cc   :  { %v942_v17 = vadd.f32 %v941_v16, %v934_v9  ;;  %v1624_v9 = vld [vmem:[#allocation10 + $0x70] sm:$0xf]  ;;  %v1687_v16 = vld [vmem:[#allocation10 + $0x74] sm:$0xf] }
 0x3cd   :  { %1215 = vmatpush.bf16.msrb.mxu0 %v1670_v48  ;;  %v1625_v13 = vor.u32 %v1688_v15, %v1624_v9  ;;  %v1568_v48 = vld [vmem:[#allocation10] sm:$0xf]  ;;  %v1164_v9 = vld [vmem:[#allocation2 + $0x7] ss:$0 sm:$0xff] }
 0x3ce   :  { %v943_v20 = vrot.slane %v942_v17, 2 }
 0x3cf   :  { %1339 = vmatpush.bf16.msrb.mxu1 %v1625_v13 }
 0x3d0   :  { %v944_v22 = vadd.f32 %v943_v20, %v942_v17  ;;  %v1626_v17 = vld [vmem:[#allocation10 + $0x78] sm:$0xf0]  ;;  %v1686_v20 = vld [vmem:[#allocation10 + $0x64] sm:$0xf0] }
 0x3d1   :  { %1216 = vmatpush.bf16.msrb.mxu0 %v1669_v0  ;;  %v1674_v0 = vld [vmem:[#allocation10 + $0x4] sm:$0xf0] }
 0x3d2   :  { %v945_v7 = vrot.slane %v944_v22, 1 }
 0x3d4   :  { %v946_v27 = vadd.f32 %v945_v7, %v944_v22  ;;  %v1629_v22 = vor.u32 %v1687_v16, %v1626_v17  ;;  %v1617_v7 = vor.u32 %v1686_v20, %v1616_v18 }
 0x3d5   :  { %1217 = vmatpush.bf16.msrb.mxu0 %v1668_v1  ;;  %v1673_v1 = vld [vmem:[#allocation10 + $0x4] sm:$0xf] }
 0x3d6   :  { %v954_v29 = vsel %vm949_vm7, %v946_v27, %v940_v11  ;;  %1352 = vmatpush.bf16.msrb.mxu2 %v1629_v22  ;;  %1340 = vmatpush.bf16.msrb.mxu1 %v1617_v7 }
 0x3d7   :  { %v729_v30 = vpop.permute.xlu0 %728  ;;  %v957_v10 = vpack.c.bf16 %v954_v29, %v954_v29 }
 0x3d8   :  { %v738_v32 = vmul.f32 %v729_v30, %v714_v5  ;;  %v1621_v5 = vor.u32 %v1685_v23, %v1618_v24 }
 0x3d9   :  { %1108 = vmatmul.bf16.vlgmr.msra.gmra.mxu3 %v957_v10  ;;  %1218 = vmatpush.bf16.msrb.mxu0 %v1667_v3  ;;  %v1570_v3 = vld [vmem:[#allocation10 + $0x8] sm:$0xf0] }
 0x3da   :  { %v747_v33 = vadd.f32 %v739_v31, %v738_v32  ;;  %1353 = vmatpush.bf16.msrb.mxu2 %v1621_v5  ;;  %v1143_v32 = vld [vmem:[#allocation2 + $0x5] ss:$0 sm:$0xff] }
 0x3dc   :  { %v748_v34 = vrot.slane %v747_v33, 4 }
 0x3dd   :  { %1219 = vmatpush.bf16.msrb.mxu0 %v1666_v4  ;;  %v1569_v4 = vor.u32 %v1674_v0, %v1568_v48 }
 0x3de   :  { %v749_v36 = vadd.f32 %v748_v34, %v747_v33  ;;  %v1145_v33 = vld [vmem:[#allocation2 + $0x6] ss:$0 sm:$0xff] }
 0x3e0   :  { %v750_v37 = vrot.slane %v749_v36, 2 }
 0x3e1   :  { %1220 = vmatpush.bf16.msrb.mxu0 %v1665_v8  ;;  %v1573_v8 = vor.u32 %v1673_v1, %v1570_v3 }
 0x3e2   :  { %v751_v38 = vadd.f32 %v750_v37, %v749_v36  ;;  %v1608_v37 = vld [vmem:[#allocation10 + $0x50] sm:$0xf] }
 0x3e4   :  { %v752_v41 = vrot.slane %v751_v38, 1 }
 0x3e6   :  { %v753_v14 = vadd.f32 %v752_v41, %v751_v38  ;;  %v1684_v38 = vld [vmem:[#allocation10 + $0x54] sm:$0xf0] }
 0x3e7   :  { %v1609_v41 = vor.u32 %v1684_v38, %v1608_v37 }
 0x3e8   :  { %v950_v43 = vsel %vm949_vm7, %v753_v14, %v746_v42  ;;  %v1610_v42 = vld [vmem:[#allocation10 + $0x58] sm:$0xf0] }
 0x3e9   :  { %v956_v45 = vpack.c.bf16 %v950_v43, %v950_v43  ;;  %v1613_v14 = vor.u32 %v1683_v40, %v1610_v42  ;;  %1341 = vmatpush.bf16.msrb.mxu1 %v1609_v41  ;;  %v1600_v43 = vld [vmem:[#allocation10 + $0x40] sm:$0xf] }
 0x3eb   :  { %1095 = vmatmul.bf16.vlgmr.msra.gmra.mxu2 %v956_v45  ;;  %v1682_v45 = vld [vmem:[#allocation10 + $0x44] sm:$0xf0] }
 0x3ec   :  { %1354 = vmatpush.bf16.msrb.mxu2 %v1613_v14 }
 0x45c   :  { %v1109_v46 = vpop.f32.mrf.mxu3 }
 0x464   :  { %v1111_v47 = vpop.f32.mrf.mxu3 }
 0x465   :  { %v1601_v47 = vor.u32 %v1682_v45, %v1600_v43 }
 0x467   :  { %1342 = vmatpush.bf16.msrb.mxu1 %v1601_v47 }
 0x46e   :  { %v1096_v44 = vpop.f32.mrf.mxu2 }
 0x46f   :  { %v1097_v2 = vadd.f32 %v1096_v44, %v990_v39  ;;  %v1602_v39 = vld [vmem:[#allocation10 + $0x48] sm:$0xf0] }
 0x471   :  { %v1110_v49 = vadd.f32 %v1109_v46, %v1097_v2  ;;  %v1681_v46 = vld [vmem:[#allocation10 + $0x44] sm:$0xf]  ;;  %v1592_v2 = vld [vmem:[#allocation10 + $0x30] sm:$0xf] }
 0x472   :  { %v1605_v44 = vor.u32 %v1681_v46, %v1602_v39 }
 0x473   :  { %v1114_v50 = vsel %vm1113_vm8, %v1110_v49, 0.0 }
 0x474   :  { %1115 = vadd.xlane.f32.xlu1 %v1114_v50  ;;  %v1679_v50 = vld [vmem:[#allocation10 + $0x34] sm:$0xf]  ;;  %1355 = vmatpush.bf16.msrb.mxu2 %v1605_v44 }
 0x475   :  { %v1597_v54 = vor.u32 %v1679_v50, %v1594_v51 }
 0x476   :  { %v1098_v6 = vpop.f32.mrf.mxu2 }
 0x478   :  { %1356 = vmatpush.bf16.msrb.mxu2 %v1597_v54 }
 0x4e7   :  { %v1116_v57 = vpop.xlane.xlu1 %1115 }
 0x4e8   :  { %v1124_v58 = vmul.f32 %v1123_v12, %v1116_v57  ;;  %v1576_v57 = vld [vmem:[#allocation10 + $0x10] sm:$0xf] }
 0x4ea   :  { %v1125_v19 = vsub.f32 %v1110_v49, %v1124_v58  ;;  %v1680_v49 = vld [vmem:[#allocation10 + $0x34] sm:$0xf0] }
 0x4eb   :  { %v1593_v6 = vor.u32 %v1680_v49, %v1592_v2  ;;  %v1676_v58 = vld [vmem:[#allocation10 + $0x14] sm:$0xf0] }
 0x4ec   :  { %v1126_v61 = vmul.f32 %v1125_v19, %v1125_v19 }
 0x4ed   :  { %1343 = vmatpush.bf16.msrb.mxu1 %v1593_v6 }
 0x4ee   :  { %v1127_v59 = vsel %vm1113_vm8, %v1126_v61, 0.0  ;;  %v1578_v61 = vld [vmem:[#allocation10 + $0x18] sm:$0xf0] }
 0x4ef   :  { %1128 = vadd.xlane.f32.xlu0 %v1127_v59  ;;  %v1577_v59 = vor.u32 %v1676_v58, %v1576_v57 }
 0x4f1   :  { %1344 = vmatpush.bf16.msrb.mxu1 %v1585_v56 }
 0x4f5   :  { %1345 = vmatpush.bf16.msrb.mxu1 %v1577_v59 }
 0x4f9   :  { %1346 = vmatpush.bf16.msrb.mxu1 %v1569_v4 }
 0x562   :  { %v1129_v60 = vpop.xlane.xlu0 %1128 }
 0x563   :  { %v1130_v21 = vmul.f32 %v1129_v60, %v1123_v12  ;;  %v1589_v12 = vor.u32 %v1677_v62, %v1586_v55 }
 0x565   :  { %v1131_v25 = vadd.f32 1e-05, %v1130_v21  ;;  %1357 = vmatpush.bf16.msrb.mxu2 %v1589_v12 }
 0x567   :  { %1796 = vrsqrt.f32 %v1131_v25  ;;  %vm1138_vm11 = vweird.f32 %v1131_v25 }
 0x56d   :  { %v1797_v11 = vpop.eup %1796 }
 0x56e   :  { %v1133_v27 = vmul.f32 %v1797_v11, %v1131_v25  ;;  %vm1139_vm10 = vweird.f32 %v1797_v11 }
 0x56f   :  { %vm1140_vm12 = vmor %vm1138_vm11, %vm1139_vm10 }
 0x570   :  { %v1134_v28 = vmul.f32 %v1797_v11, %v1133_v27 }
 0x572   :  { %v1135_v29 = vmul.f32 0.5, %v1134_v28 }
 0x574   :  { %v1136_v30 = vsub.f32 1.5, %v1135_v29 }
 0x576   :  { %v1137_v10 = vmul.f32 %v1797_v11, %v1136_v30 }
 0x578   :  { %v1141_v31 = vsel %vm1140_vm12, %v1797_v11, %v1137_v10  ;;  %v1253_v11 = vld [vmem:[#allocation2 + $0x10] ss:$8 sm:$0x3] }
 0x579   :  { %v1142_v26 = vmul.f32 %v1141_v31, %v1125_v19  ;;  %v1675_v19 = vld [vmem:[#allocation10 + $0x14] sm:$0xf]  ;;  %v1256_v27 = vperm.slane %v1253_v11, 1  ;;  %v1255_v28 = vperm.slane %v1253_v11, 0 }
 0x57a   :  { %v1581_v63 = vor.u32 %v1675_v19, %v1578_v61 }
 0x57b   :  { %v1144_v34 = vmul.f32 %v1143_v32, %v1142_v26 }
 0x57c   :  { %1358 = vmatpush.bf16.msrb.mxu2 %v1581_v63 }
 0x57d   :  { %v1146_v35 = vadd.f32 %v1145_v33, %v1144_v34 }
 0x57f   :  { %v1147_v36 = vpack.c.bf16 %v1146_v35, %v1146_v35 }
 0x580   :  { %1359 = vmatpush.bf16.msrb.mxu2 %v1573_v8 }
 0x581   :  { %1221 = vmatmul.bf16.vlgmr.msrb.gmra.mxu0 %v1147_v36 }
 0x5fe   :  { %v1222_v15 = vpop.f32.mrf.mxu0 }
 0x5ff   :  { %v1223_v16 = vadd.f32 %v1222_v15, %v1164_v9 }
 0x601   :  { %v1227_v60 = vmul.f32 0.044715, %v1223_v16  ;;  %v1226_v23 = vmul.f32 0.5, %v1223_v16 }
 0x603   :  { %v1228_v13 = vmul.f32 %v1227_v60, %v1223_v16 }
 0x605   :  { %v1229_v17 = vmul.f32 %v1228_v13, %v1223_v16 }
 0x606   :  { %v1224_v18 = vpop.f32.mrf.mxu0 }
 0x607   :  { %v1230_v20 = vadd.f32 %v1229_v17, %v1223_v16 }
 0x609   :  { %v1231_v21 = vmul.f32 0.7978846, %v1230_v20 }
 0x60b   :  { %1798 = vtanh.f32 %v1231_v21 }
 0x611   :  { %v1799_v22 = vpop.eup %1798 }
 0x612   :  { %v1233_v24 = vadd.f32 1.0, %v1799_v22 }
 0x614   :  { %v1234_v7 = vmul.f32 %v1233_v24, %v1226_v23 }
 0x616   :  { %v1235_v25 = vpack.c.bf16 %v1234_v7, %v1234_v7 }
 0x618   :  { %1347 = vmatmul.bf16.vlgmr.msrb.gmra.mxu1 %v1235_v25  ;;  %1360 = vmatmul.bf16.vlgmr.msrb.gmra.mxu2 %v1235_v25 }
 0x695   :  { %v1348_v5 = vpop.f32.mrf.mxu1 }
 0x696   :  { %v1349_v31 = vadd.f32 %v1348_v5, %v1255_v28 }
 0x69b   :  { %v1361_v29 = vpop.f32.mrf.mxu2 }
 0x69c   :  { %v1362_v30 = vadd.f32 %v1361_v29, %v1256_v27 }
 0x69d   :  { %v1350_v10 = vpop.f32.mrf.mxu1 }
 0x69e   :  { %v1367_v32 = vrot.slane %v1362_v30, 6 }
 0x6a0   :  { %v1368_v26 = vsel %vm1113_vm8, %v1349_v31, %v1367_v32 }
 0x6a1   :  { %1370 = vst [vmem:[#allocation11] sm:$0xf] %v1368_v26 }
 0x6a2   :  { %1381 = dma.vmem_to_hbm [thread:$0]  %s1377_s14, 64, %s1379_s8, [#allocation4]  }
 0x6a3   :  { %v1363_v33 = vpop.f32.mrf.mxu2 }
 0x6a4   :  { %1950 = dma.done.wait [#allocation4], 64  }
 0x6a5   :  { %1951 = vsyncadd [#allocation4], 4294967232 }
 0x6a6   :  { %1386 = vsyncpa [#allocation3], 1 }
 0x6a7   :  { %1387 = vsyncpa [#allocation6], 1 }
 0x6a8   :  { %1388 = vsyncpa [#allocation9], 1 }
 0x6a9   :  { %1389 = vsyncpa [#allocation4], 1 }

</bundles_post_ra>
